<compile_context>
chip_gen: v7x
topology: tpu7x:2x2x1
jax: 0.10.0
libtpu: 0.0.40
codegen_flags: <defaults>
</compile_context>

<pallas_src>
from math import sqrt

import jax
import jax.numpy as jnp
import numpy as np
from jax.experimental import pallas as pl
from jax.experimental.pallas import tpu as pltpu

# ----------------------------------------------------------------------------
# Hyper-parameters consistent with STGENET.__init__ / forward
# ----------------------------------------------------------------------------
B = 2                   # batch
C_IN = 8                # in_chans (graph nodes)
C_OUT = 32              # out_chans
N_CLASSES = 4
L = 32                  # input_time_length
W_SL = 8                # slide_window
T = L * W_SL            # total time samples = 256
K_CONV = 15             # timeconv kernel_size (odd -> 'same' pad = K//2)
PAD = (K_CONV - 1) // 2
SR = 128                # sampling_rate -> AvgPool1d(SR//2, SR//2)
P = SR // 2             # pool window = 64
J = T // P              # pooled length = 4
FC_IN = C_OUT * J       # 128
K_SPATIAL = 2           # SpatialGraph.k
K_TIME = 2              # TimeGraph.k
BN_EPS = 1e-5
SQRT_2_OVER_PI = 0.7978845608028654
GELU_C = 0.044715


# ----------------------------------------------------------------------------
# Fused Pallas kernel: `nb` batch elements stacked along the time/lane axis
# per grid step (nb=B on single-TC chips, nb=1 on v7x megacore).
# ----------------------------------------------------------------------------
def _make_fused_kernel(nb):
    w = nb * T

    def kernel(x_ref, w2_ref, bias_ref, v_ref, bfc_ref, o_ref, im_ref):
        x = x_ref[0]                                          # (C_IN, nb*T) f32

        # Per-batch time index: the batch seam (t = 256) is masked exactly
        # like the zero-pad edges of the 'same' convolution.
        t_idx = jax.lax.broadcasted_iota(jnp.int32, (C_IN, w), 1)
        if nb > 1:
            t_idx = jnp.bitwise_and(t_idx, T - 1)             # t mod 256 (pow2)

        # Lane-aligned im2col of the RAW 8-channel input.  The spatial 1x1
        # conv, BN1 scale/shift and BN2 scale are all folded into the conv
        # weight / bias slab on the host, so row-block k simply holds x
        # shifted by (k - PAD), zeroed outside each batch segment.
        for k in range(K_CONV):
            s = k - PAD
            if s == 0:
                col = x
            else:
                col = pltpu.roll(x, shift=(-s) % w, axis=1)   # col[:,t]=x[:,t+s]
                if s > 0:
                    col = jnp.where(t_idx < T - s, col, 0.0)
                else:
                    col = jnp.where(t_idx >= -s, col, 0.0)
            im_ref[pl.ds(k * C_IN, C_IN), :] = col            # (8,128)-aligned

        # ONE deep MXU contraction (32,120)@(120,nb*256), single-pass bf16
        # with f32 accumulation, plus the edge-aware bias slab.
        h2 = jnp.dot(w2_ref[...], im_ref[...].astype(jnp.bfloat16),
                     preferred_element_type=jnp.float32)
        h2 = h2 + bias_ref[...]

        # GELU, tanh approximation (EUP) instead of the VPU erf polynomial.
        u = SQRT_2_OVER_PI * (h2 + GELU_C * (h2 * h2 * h2))
        g = 0.5 * h2 * (1.0 + jnp.tanh(u))

        # TimeGraph GCN + AvgPool1d + Linear folded into V[n, c, t]:
        # per-batch VPU multiply + reduce, lane-dense row store of the logits.
        v = v_ref[...]                                        # (N, C_OUT, T)
        for b in range(nb):
            gb = g[:, b * T:(b + 1) * T]                      # lane-aligned slice
            prod = gb[None, :, :] * v                         # (N, C_OUT, T)
            s_row = jnp.sum(jnp.sum(prod, axis=2), axis=1)[None, :]   # (1, N)
            o_ref[0, pl.ds(b, 1), :] = s_row + bfc_ref[...]

    return kernel


def _batches_per_step():
    # v7x has 2 TensorCores/chip: keep grid=(B,) "parallel" so each core takes
    # one batch element.  Single-TC chips (v5e/v6e): collapse the grid to one
    # step and stack the batch along the time axis instead (each grid step is
    # ~0.35us of fixed overhead on a ~16 MFLOP kernel).
    try:
        kind = jax.devices()[0].device_kind.lower()
    except Exception:
        kind = ""
    if ("v7" in kind) or ("7x" in kind):
        return 1
    return B


def stgenet_fused(x, f, nb):
    gsteps = B // nb
    w = nb * T
    # Stack nb batch elements along the time/lane axis: (gsteps, C_IN, nb*T).
    x_g = (x.reshape(gsteps, nb, C_IN, T)
             .transpose(0, 2, 1, 3)
             .reshape(gsteps, C_IN, w))
    bias = jnp.tile(f["bias_slab"], (1, nb)) if nb > 1 else f["bias_slab"]

    bcast2 = lambda shape: pl.BlockSpec(shape, lambda g: (0, 0))
    out = pl.pallas_call(
        _make_fused_kernel(nb),
        out_shape=jax.ShapeDtypeStruct((gsteps, nb, N_CLASSES), jnp.float32),
        grid=(gsteps,),
        in_specs=[
            pl.BlockSpec((1, C_IN, w), lambda g: (g, 0, 0)),           # x
            bcast2((C_OUT, K_CONV * C_IN)),                            # W2eff (bf16)
            bcast2((C_OUT, w)),                                        # bias slab
            pl.BlockSpec((N_CLASSES, C_OUT, T), lambda g: (0, 0, 0)),  # V
            bcast2((1, N_CLASSES)),                                    # fc bias row
        ],
        out_specs=pl.BlockSpec((1, nb, N_CLASSES), lambda g: (g, 0, 0)),
        scratch_shapes=[pltpu.VMEM((K_CONV * C_IN, w), jnp.float32)],
        compiler_params=pltpu.CompilerParams(
            dimension_semantics=("parallel",)),
    )(x_g, f["w2x"], bias, f["v"], f["bfc_row"])
    return out.reshape(B, N_CLASSES)


# ----------------------------------------------------------------------------
# Parameter construction (deterministic, mirrors __init__ shapes)
# ----------------------------------------------------------------------------
def _sym_normalize(a):
    # TODO(synk): `normalize` is not defined in the reference source; we use
    # symmetric GCN normalization D^{-1/2} A D^{-1/2}.
    d = jnp.sum(a, axis=1)
    dinv = jnp.where(d > 0, 1.0 / jnp.sqrt(d), 0.0)
    return a * dinv[:, None] * dinv[None, :]


def make_params(key):
    ks = jax.random.split(key, 12)

    # SpatialGraph(n_nodes=C_IN, adj=Adj, k=K_SPATIAL, spatial_GCN=True)
    adj_in = jax.random.uniform(ks[0], (C_IN, C_IN), jnp.float32)
    xs, ys = np.tril_indices(C_IN, k=-1)
    e = jnp.zeros((C_IN, C_IN), jnp.float32).at[xs, ys].set(adj_in[xs, ys])
    e = e + e.T + jnp.eye(C_IN, dtype=jnp.float32)
    e = _sym_normalize(e)
    a_sp = e + jnp.eye(C_IN, dtype=jnp.float32)   # returned as node_weights

    # TimeGraph(slide_window, K_TIME, C_OUT, time_GCN=True)
    adj_t = 0.5 * jnp.ones((W_SL, W_SL), jnp.float32) + 1.5 * jnp.eye(W_SL, dtype=jnp.float32)
    adj_t = (adj_t + adj_t.T) / 2.0
    a_t = _sym_normalize(adj_t)
    adj_time_relu = jax.nn.relu(adj_t)            # returned as space_node_weights

    # spatialconv: Conv1d(C_IN, C_OUT, 1, bias=False) + BatchNorm1d (eval fold)
    w_sp = jax.random.normal(ks[1], (C_OUT, C_IN), jnp.float32) * sqrt(2.0 / (C_IN + C_OUT))
    g1 = 1.0 + 0.1 * jax.random.normal(ks[2], (C_OUT,), jnp.float32)
    b1 = 0.1 * jax.random.normal(ks[3], (C_OUT,), jnp.float32)
    rm1 = 0.1 * jax.random.normal(ks[4], (C_OUT,), jnp.float32)
    rv1 = 1.0 + 0.1 * jax.random.uniform(ks[5], (C_OUT,), jnp.float32)
    sc1 = g1 / jnp.sqrt(rv1 + BN_EPS)
    sh1 = b1 - rm1 * sc1

    # timeconv: Conv1d(C_OUT, C_OUT, K_CONV, padding='same', bias=False) + BN
    fan = C_OUT * K_CONV
    w_conv = jax.random.normal(ks[6], (C_OUT, C_OUT, K_CONV), jnp.float32) * sqrt(2.0 / (2 * fan))
    w_taps = jnp.transpose(w_conv, (2, 0, 1))     # (K, out, in): tap-major
    g2 = 1.0 + 0.1 * jax.random.normal(ks[7], (C_OUT,), jnp.float32)
    b2 = 0.1 * jax.random.normal(ks[8], (C_OUT,), jnp.float32)
    rm2 = 0.1 * jax.random.normal(ks[9], (C_OUT,), jnp.float32)
    rv2 = 1.0 + 0.1 * jax.random.uniform(ks[10], (C_OUT,), jnp.float32)
    sc2 = g2 / jnp.sqrt(rv2 + BN_EPS)
    sh2 = b2 - rm2 * sc2

    # downSampling: AvgPool1d(P, P) as a (T, J) matmul
    pool_mat = jnp.repeat(jnp.eye(J, dtype=jnp.float32), P, axis=0) / P

    # fc: Linear(FC_IN, N_CLASSES); glorot_weight_zero_bias -> zero bias
    w_fc = jax.random.normal(ks[11], (N_CLASSES, FC_IN), jnp.float32) * (1.0 / sqrt(FC_IN))
    b_fc = jnp.zeros((N_CLASSES,), jnp.float32)

    return dict(a_sp=a_sp, a_t=a_t, adj_time_relu=adj_time_relu, w_sp=w_sp,
                sc1=sc1, sh1=sh1, w_taps=w_taps, sc2=sc2, sh2=sh2,
                pool_mat=pool_mat, w_fc=w_fc, b_fc=b_fc)


def fold_params(p):
    """Host-side constant folding of every data-independent linear stage."""
    hp = jax.lax.Precision.HIGHEST

    # Spatial GCN (A^k) + 1x1 conv + BN1 scale -> one (C_OUT, C_IN) matrix.
    a_pow = jnp.linalg.matrix_power(p["a_sp"], K_SPATIAL)
    w_eff = p["sc1"][:, None] * jnp.dot(p["w_sp"], a_pow, precision=hp)   # (32, 8)

    # Temporal-conv taps scaled by BN2, then the spatial stage folded in:
    #   W2eff_k = (sc2 . W2_k) @ W_eff  ->  concat tap-major to (32, 15*8).
    w2_bn = p["sc2"][None, :, None] * p["w_taps"]                         # (K, 32, 32)
    w2eff = jnp.einsum("koi,ij->koj", w2_bn, w_eff, precision=hp)         # (K, 32, 8)
    w2x = jnp.transpose(w2eff, (1, 0, 2)).reshape(C_OUT, K_CONV * C_IN)
    w2x = w2x.astype(jnp.bfloat16)                # single-pass MXU operand

    # Edge-aware bias slab (32, T): sh1 contributes only where the tap window
    # lies inside the zero-padded signal; BN2 shift sh2 added on top.
    bsh = jnp.einsum("koi,i->ko", w2_bn, p["sh1"], precision=hp)          # (K, 32)
    valid = np.zeros((K_CONV, T), np.float32)
    for k in range(K_CONV):
        s = k - PAD
        valid[k, max(0, -s):min(T, T - s)] = 1.0
    bias_slab = (jnp.einsum("ko,kt->ot", bsh, jnp.asarray(valid), precision=hp)
                 + p["sh2"][:, None])                                     # (32, T)

    # TimeGraph GCN (A_t^k over the slide window) as a (T, T) operator
    # Gt = kron(A_t^k ^T, I_L), folded with AvgPool1d and the Linear layer:
    #   logits[n] = sum_{c,t} gelu_out[c,t] * V[n,c,t] + b[n]
    at_pow = jnp.linalg.matrix_power(p["a_t"], K_TIME)
    gt = jnp.kron(at_pow.T, jnp.eye(L, dtype=jnp.float32))                # (T, T)
    gp = jnp.dot(gt, p["pool_mat"], precision=hp)                         # (T, J)
    wfc_r = p["w_fc"].reshape(N_CLASSES, C_OUT, J)
    v = jnp.einsum("tj,ncj->nct", gp, wfc_r, precision=hp)                # (N, 32, T)

    return dict(w2x=w2x, bias_slab=bias_slab, v=v,
                bfc_row=p["b_fc"].reshape(1, N_CLASSES))


# ----------------------------------------------------------------------------
# Full forward: one fused Pallas kernel, no XLA glue between stages
# ----------------------------------------------------------------------------
def stgenet_forward(x, params, folded, nb):
    # The PyTorch forward's initial view/permute round-trip is exactly undone
    # by SpatialGraph, so the (B, C, T) layout is kept end to end.
    logits = stgenet_fused(x, folded, nb)
    return logits, params["a_sp"], params["adj_time_relu"]


# ----------------------------------------------------------------------------
# Pure-JAX reference (unfolded math, f32 HIGHEST) for the correctness check
# ----------------------------------------------------------------------------
def reference_forward(x, p):
    hp_prec = jax.lax.Precision.HIGHEST
    h = x
    for _ in range(K_SPATIAL):
        h = jnp.einsum("ij,bjt->bit", p["a_sp"], h, precision=hp_prec)
    h = jnp.einsum("oi,bit->bot", p["w_sp"], h, precision=hp_prec)
    h = h * p["sc1"][None, :, None] + p["sh1"][None, :, None]
    hpad = jnp.pad(h, ((0, 0), (0, 0), (PAD, PAD)))
    acc = jnp.zeros((B, C_OUT, T), jnp.float32)
    for k in range(K_CONV):
        acc = acc + jnp.einsum("oi,bit->bot", p["w_taps"][k],
                               hpad[:, :, k:k + T], precision=hp_prec)
    h = acc * p["sc2"][None, :, None] + p["sh2"][None, :, None]
    h = 0.5 * h * (1.0 + jax.lax.erf(h / np.sqrt(2.0)))
    slab = h.reshape(B, C_OUT, W_SL, L).transpose(0, 2, 1, 3).reshape(B, W_SL, C_OUT * L)
    for _ in range(K_TIME):
        slab = jnp.einsum("wv,bvd->bwd", p["a_t"], slab, precision=hp_prec)
    h = slab.reshape(B, W_SL, C_OUT, L).transpose(0, 2, 1, 3).reshape(B, C_OUT, T)
    pooled = h.reshape(B, C_OUT, J, P).mean(-1)
    flat = pooled.reshape(B, FC_IN)
    return jnp.dot(flat, p["w_fc"].T, precision=hp_prec) + p["b_fc"][None, :]


if __name__ == "__main__":
    key = jax.random.PRNGKey(0)
    pkey, xkey = jax.random.split(key)
    params = make_params(pkey)
    folded = fold_params(params)
    x = jax.random.normal(xkey, (B, C_IN, T), jnp.float32)

    nb = _batches_per_step()      # trace-time constant, chip-dependent
    fwd = jax.jit(lambda xx, pp, ff: stgenet_forward(xx, pp, ff, nb))
    logits, node_weights, space_node_weights = fwd(x, params, folded)
    jax.block_until_ready(logits)

    ref = reference_forward(x, params)
    np.testing.assert_allclose(np.asarray(logits), np.asarray(ref),
                               rtol=2e-2, atol=2e-2)
    assert logits.shape == (B, N_CLASSES)
    assert node_weights.shape == (C_IN, C_IN)
    assert space_node_weights.shape == (W_SL, W_SL)
    print("KERNEL_OK")
</pallas_src>

<mosaic_0001>
module attributes {stable_mosaic.version = 11 : i64} {
  func.func @kernel(%arg0: i32, %arg1: memref<1x8x512xf32, #tpu.memory_space<vmem>>, %arg2: memref<32x120xbf16, #tpu.memory_space<vmem>>, %arg3: memref<32x512xf32, #tpu.memory_space<vmem>>, %arg4: memref<4x32x256xf32, #tpu.memory_space<vmem>>, %arg5: memref<1x4xf32, #tpu.memory_space<vmem>>, %arg6: memref<1x2x4xf32, #tpu.memory_space<vmem>>, %arg7: memref<120x512xf32, #tpu.memory_space<vmem>>) attributes {dimension_semantics = [#tpu.dimension_semantics<parallel>], iteration_bounds = array<i64: 1>, scalar_prefetch = 0 : i64, scratch_operands = 1 : i64, tpu.core_type = #tpu.core_type<tc>, window_params = [{transform_indices = @transform_0, window_bounds = array<i64: 1, 8, 512>}, {pipeline_mode = #tpu.pipeline_mode<synchronous>, transform_indices = @transform_1, window_bounds = array<i64: 32, 120>}, {pipeline_mode = #tpu.pipeline_mode<synchronous>, transform_indices = @transform_2, window_bounds = array<i64: 32, 512>}, {pipeline_mode = #tpu.pipeline_mode<synchronous>, transform_indices = @transform_3, window_bounds = array<i64: 4, 32, 256>}, {pipeline_mode = #tpu.pipeline_mode<synchronous>, transform_indices = @transform_4, window_bounds = array<i64: 1, 4>}, {transform_indices = @transform_5, window_bounds = array<i64: 1, 2, 4>}]} {
    %c0 = arith.constant 0 : index
    %c0_0 = arith.constant 0 : index
    %c0_1 = arith.constant 0 : index
    %0 = vector.load %arg1[%c0, %c0_0, %c0_1] : memref<1x8x512xf32, #tpu.memory_space<vmem>>, vector<1x8x512xf32>
    %1 = vector.shape_cast %0 : vector<1x8x512xf32> to vector<8x512xf32>
    %2 = tpu.iota {dimensions = array<i32: 1>} : vector<8x512xi32>
    %c255_i32 = arith.constant 255 : i32
    %3 = vector.broadcast %c255_i32 : i32 to vector<8x512xi32>
    %4 = arith.andi %2, %3 : vector<8x512xi32>
    %c7_i32 = arith.constant 7 : i32
    %5 = tpu.dynamic_rotate %1 by %c7_i32 dim 1 : vector<8x512xf32>, i32 -> vector<8x512xf32>
    %c7_i32_2 = arith.constant 7 : i32
    %6 = vector.broadcast %c7_i32_2 : i32 to vector<8x512xi32>
    %7 = arith.cmpi sge, %4, %6 : vector<8x512xi32>
    %cst = arith.constant 0.000000e+00 : f32
    %8 = vector.broadcast %cst : f32 to vector<8x512xf32>
    %9 = arith.select %7, %5, %8 : vector<8x512xi1>, vector<8x512xf32>
    %c0_3 = arith.constant 0 : index
    %c0_4 = arith.constant 0 : index
    %10 = vector.load %arg7[%c0_3, %c0_4] : memref<120x512xf32, #tpu.memory_space<vmem>>, vector<8x512xf32>
    tpu.vector_store %arg7[%c0_3, %c0_4], %9 {strides = array<i32>} : memref<120x512xf32, #tpu.memory_space<vmem>>, vector<8x512xf32>,
    %c6_i32 = arith.constant 6 : i32
    %11 = tpu.dynamic_rotate %1 by %c6_i32 dim 1 : vector<8x512xf32>, i32 -> vector<8x512xf32>
    %c6_i32_5 = arith.constant 6 : i32
    %12 = vector.broadcast %c6_i32_5 : i32 to vector<8x512xi32>
    %13 = arith.cmpi sge, %4, %12 : vector<8x512xi32>
    %cst_6 = arith.constant 0.000000e+00 : f32
    %14 = vector.broadcast %cst_6 : f32 to vector<8x512xf32>
    %15 = arith.select %13, %11, %14 : vector<8x512xi1>, vector<8x512xf32>
    %c8 = arith.constant 8 : index
    %c0_7 = arith.constant 0 : index
    %16 = vector.load %arg7[%c8, %c0_7] : memref<120x512xf32, #tpu.memory_space<vmem>>, vector<8x512xf32>
    tpu.vector_store %arg7[%c8, %c0_7], %15 {strides = array<i32>} : memref<120x512xf32, #tpu.memory_space<vmem>>, vector<8x512xf32>,
    %c5_i32 = arith.constant 5 : i32
    %17 = tpu.dynamic_rotate %1 by %c5_i32 dim 1 : vector<8x512xf32>, i32 -> vector<8x512xf32>
    %c5_i32_8 = arith.constant 5 : i32
    %18 = vector.broadcast %c5_i32_8 : i32 to vector<8x512xi32>
    %19 = arith.cmpi sge, %4, %18 : vector<8x512xi32>
    %cst_9 = arith.constant 0.000000e+00 : f32
    %20 = vector.broadcast %cst_9 : f32 to vector<8x512xf32>
    %21 = arith.select %19, %17, %20 : vector<8x512xi1>, vector<8x512xf32>
    %c16 = arith.constant 16 : index
    %c0_10 = arith.constant 0 : index
    %22 = vector.load %arg7[%c16, %c0_10] : memref<120x512xf32, #tpu.memory_space<vmem>>, vector<8x512xf32>
    tpu.vector_store %arg7[%c16, %c0_10], %21 {strides = array<i32>} : memref<120x512xf32, #tpu.memory_space<vmem>>, vector<8x512xf32>,
    %c4_i32 = arith.constant 4 : i32
    %23 = tpu.dynamic_rotate %1 by %c4_i32 dim 1 : vector<8x512xf32>, i32 -> vector<8x512xf32>
    %c4_i32_11 = arith.constant 4 : i32
    %24 = vector.broadcast %c4_i32_11 : i32 to vector<8x512xi32>
    %25 = arith.cmpi sge, %4, %24 : vector<8x512xi32>
    %cst_12 = arith.constant 0.000000e+00 : f32
    %26 = vector.broadcast %cst_12 : f32 to vector<8x512xf32>
    %27 = arith.select %25, %23, %26 : vector<8x512xi1>, vector<8x512xf32>
    %c24 = arith.constant 24 : index
    %c0_13 = arith.constant 0 : index
    %28 = vector.load %arg7[%c24, %c0_13] : memref<120x512xf32, #tpu.memory_space<vmem>>, vector<8x512xf32>
    tpu.vector_store %arg7[%c24, %c0_13], %27 {strides = array<i32>} : memref<120x512xf32, #tpu.memory_space<vmem>>, vector<8x512xf32>,
    %c3_i32 = arith.constant 3 : i32
    %29 = tpu.dynamic_rotate %1 by %c3_i32 dim 1 : vector<8x512xf32>, i32 -> vector<8x512xf32>
    %c3_i32_14 = arith.constant 3 : i32
    %30 = vector.broadcast %c3_i32_14 : i32 to vector<8x512xi32>
    %31 = arith.cmpi sge, %4, %30 : vector<8x512xi32>
    %cst_15 = arith.constant 0.000000e+00 : f32
    %32 = vector.broadcast %cst_15 : f32 to vector<8x512xf32>
    %33 = arith.select %31, %29, %32 : vector<8x512xi1>, vector<8x512xf32>
    %c32 = arith.constant 32 : index
    %c0_16 = arith.constant 0 : index
    %34 = vector.load %arg7[%c32, %c0_16] : memref<120x512xf32, #tpu.memory_space<vmem>>, vector<8x512xf32>
    tpu.vector_store %arg7[%c32, %c0_16], %33 {strides = array<i32>} : memref<120x512xf32, #tpu.memory_space<vmem>>, vector<8x512xf32>,
    %c2_i32 = arith.constant 2 : i32
    %35 = tpu.dynamic_rotate %1 by %c2_i32 dim 1 : vector<8x512xf32>, i32 -> vector<8x512xf32>
    %c2_i32_17 = arith.constant 2 : i32
    %36 = vector.broadcast %c2_i32_17 : i32 to vector<8x512xi32>
    %37 = arith.cmpi sge, %4, %36 : vector<8x512xi32>
    %cst_18 = arith.constant 0.000000e+00 : f32
    %38 = vector.broadcast %cst_18 : f32 to vector<8x512xf32>
    %39 = arith.select %37, %35, %38 : vector<8x512xi1>, vector<8x512xf32>
    %c40 = arith.constant 40 : index
    %c0_19 = arith.constant 0 : index
    %40 = vector.load %arg7[%c40, %c0_19] : memref<120x512xf32, #tpu.memory_space<vmem>>, vector<8x512xf32>
    tpu.vector_store %arg7[%c40, %c0_19], %39 {strides = array<i32>} : memref<120x512xf32, #tpu.memory_space<vmem>>, vector<8x512xf32>,
    %c1_i32 = arith.constant 1 : i32
    %41 = tpu.dynamic_rotate %1 by %c1_i32 dim 1 : vector<8x512xf32>, i32 -> vector<8x512xf32>
    %c1_i32_20 = arith.constant 1 : i32
    %42 = vector.broadcast %c1_i32_20 : i32 to vector<8x512xi32>
    %43 = arith.cmpi sge, %4, %42 : vector<8x512xi32>
    %cst_21 = arith.constant 0.000000e+00 : f32
    %44 = vector.broadcast %cst_21 : f32 to vector<8x512xf32>
    %45 = arith.select %43, %41, %44 : vector<8x512xi1>, vector<8x512xf32>
    %c48 = arith.constant 48 : index
    %c0_22 = arith.constant 0 : index
    %46 = vector.load %arg7[%c48, %c0_22] : memref<120x512xf32, #tpu.memory_space<vmem>>, vector<8x512xf32>
    tpu.vector_store %arg7[%c48, %c0_22], %45 {strides = array<i32>} : memref<120x512xf32, #tpu.memory_space<vmem>>, vector<8x512xf32>,
    %c56 = arith.constant 56 : index
    %c0_23 = arith.constant 0 : index
    %47 = vector.load %arg7[%c56, %c0_23] : memref<120x512xf32, #tpu.memory_space<vmem>>, vector<8x512xf32>
    tpu.vector_store %arg7[%c56, %c0_23], %1 {strides = array<i32>} : memref<120x512xf32, #tpu.memory_space<vmem>>, vector<8x512xf32>,
    %c511_i32 = arith.constant 511 : i32
    %48 = tpu.dynamic_rotate %1 by %c511_i32 dim 1 : vector<8x512xf32>, i32 -> vector<8x512xf32>
    %c255_i32_24 = arith.constant 255 : i32
    %49 = vector.broadcast %c255_i32_24 : i32 to vector<8x512xi32>
    %50 = arith.cmpi slt, %4, %49 : vector<8x512xi32>
    %cst_25 = arith.constant 0.000000e+00 : f32
    %51 = vector.broadcast %cst_25 : f32 to vector<8x512xf32>
    %52 = arith.select %50, %48, %51 : vector<8x512xi1>, vector<8x512xf32>
    %c64 = arith.constant 64 : index
    %c0_26 = arith.constant 0 : index
    %53 = vector.load %arg7[%c64, %c0_26] : memref<120x512xf32, #tpu.memory_space<vmem>>, vector<8x512xf32>
    tpu.vector_store %arg7[%c64, %c0_26], %52 {strides = array<i32>} : memref<120x512xf32, #tpu.memory_space<vmem>>, vector<8x512xf32>,
    %c510_i32 = arith.constant 510 : i32
    %54 = tpu.dynamic_rotate %1 by %c510_i32 dim 1 : vector<8x512xf32>, i32 -> vector<8x512xf32>
    %c254_i32 = arith.constant 254 : i32
    %55 = vector.broadcast %c254_i32 : i32 to vector<8x512xi32>
    %56 = arith.cmpi slt, %4, %55 : vector<8x512xi32>
    %cst_27 = arith.constant 0.000000e+00 : f32
    %57 = vector.broadcast %cst_27 : f32 to vector<8x512xf32>
    %58 = arith.select %56, %54, %57 : vector<8x512xi1>, vector<8x512xf32>
    %c72 = arith.constant 72 : index
    %c0_28 = arith.constant 0 : index
    %59 = vector.load %arg7[%c72, %c0_28] : memref<120x512xf32, #tpu.memory_space<vmem>>, vector<8x512xf32>
    tpu.vector_store %arg7[%c72, %c0_28], %58 {strides = array<i32>} : memref<120x512xf32, #tpu.memory_space<vmem>>, vector<8x512xf32>,
    %c509_i32 = arith.constant 509 : i32
    %60 = tpu.dynamic_rotate %1 by %c509_i32 dim 1 : vector<8x512xf32>, i32 -> vector<8x512xf32>
    %c253_i32 = arith.constant 253 : i32
    %61 = vector.broadcast %c253_i32 : i32 to vector<8x512xi32>
    %62 = arith.cmpi slt, %4, %61 : vector<8x512xi32>
    %cst_29 = arith.constant 0.000000e+00 : f32
    %63 = vector.broadcast %cst_29 : f32 to vector<8x512xf32>
    %64 = arith.select %62, %60, %63 : vector<8x512xi1>, vector<8x512xf32>
    %c80 = arith.constant 80 : index
    %c0_30 = arith.constant 0 : index
    %65 = vector.load %arg7[%c80, %c0_30] : memref<120x512xf32, #tpu.memory_space<vmem>>, vector<8x512xf32>
    tpu.vector_store %arg7[%c80, %c0_30], %64 {strides = array<i32>} : memref<120x512xf32, #tpu.memory_space<vmem>>, vector<8x512xf32>,
    %c508_i32 = arith.constant 508 : i32
    %66 = tpu.dynamic_rotate %1 by %c508_i32 dim 1 : vector<8x512xf32>, i32 -> vector<8x512xf32>
    %c252_i32 = arith.constant 252 : i32
    %67 = vector.broadcast %c252_i32 : i32 to vector<8x512xi32>
    %68 = arith.cmpi slt, %4, %67 : vector<8x512xi32>
    %cst_31 = arith.constant 0.000000e+00 : f32
    %69 = vector.broadcast %cst_31 : f32 to vector<8x512xf32>
    %70 = arith.select %68, %66, %69 : vector<8x512xi1>, vector<8x512xf32>
    %c88 = arith.constant 88 : index
    %c0_32 = arith.constant 0 : index
    %71 = vector.load %arg7[%c88, %c0_32] : memref<120x512xf32, #tpu.memory_space<vmem>>, vector<8x512xf32>
    tpu.vector_store %arg7[%c88, %c0_32], %70 {strides = array<i32>} : memref<120x512xf32, #tpu.memory_space<vmem>>, vector<8x512xf32>,
    %c507_i32 = arith.constant 507 : i32
    %72 = tpu.dynamic_rotate %1 by %c507_i32 dim 1 : vector<8x512xf32>, i32 -> vector<8x512xf32>
    %c251_i32 = arith.constant 251 : i32
    %73 = vector.broadcast %c251_i32 : i32 to vector<8x512xi32>
    %74 = arith.cmpi slt, %4, %73 : vector<8x512xi32>
    %cst_33 = arith.constant 0.000000e+00 : f32
    %75 = vector.broadcast %cst_33 : f32 to vector<8x512xf32>
    %76 = arith.select %74, %72, %75 : vector<8x512xi1>, vector<8x512xf32>
    %c96 = arith.constant 96 : index
    %c0_34 = arith.constant 0 : index
    %77 = vector.load %arg7[%c96, %c0_34] : memref<120x512xf32, #tpu.memory_space<vmem>>, vector<8x512xf32>
    tpu.vector_store %arg7[%c96, %c0_34], %76 {strides = array<i32>} : memref<120x512xf32, #tpu.memory_space<vmem>>, vector<8x512xf32>,
    %c506_i32 = arith.constant 506 : i32
    %78 = tpu.dynamic_rotate %1 by %c506_i32 dim 1 : vector<8x512xf32>, i32 -> vector<8x512xf32>
    %c250_i32 = arith.constant 250 : i32
    %79 = vector.broadcast %c250_i32 : i32 to vector<8x512xi32>
    %80 = arith.cmpi slt, %4, %79 : vector<8x512xi32>
    %cst_35 = arith.constant 0.000000e+00 : f32
    %81 = vector.broadcast %cst_35 : f32 to vector<8x512xf32>
    %82 = arith.select %80, %78, %81 : vector<8x512xi1>, vector<8x512xf32>
    %c104 = arith.constant 104 : index
    %c0_36 = arith.constant 0 : index
    %83 = vector.load %arg7[%c104, %c0_36] : memref<120x512xf32, #tpu.memory_space<vmem>>, vector<8x512xf32>
    tpu.vector_store %arg7[%c104, %c0_36], %82 {strides = array<i32>} : memref<120x512xf32, #tpu.memory_space<vmem>>, vector<8x512xf32>,
    %c505_i32 = arith.constant 505 : i32
    %84 = tpu.dynamic_rotate %1 by %c505_i32 dim 1 : vector<8x512xf32>, i32 -> vector<8x512xf32>
    %c249_i32 = arith.constant 249 : i32
    %85 = vector.broadcast %c249_i32 : i32 to vector<8x512xi32>
    %86 = arith.cmpi slt, %4, %85 : vector<8x512xi32>
    %cst_37 = arith.constant 0.000000e+00 : f32
    %87 = vector.broadcast %cst_37 : f32 to vector<8x512xf32>
    %88 = arith.select %86, %84, %87 : vector<8x512xi1>, vector<8x512xf32>
    %c112 = arith.constant 112 : index
    %c0_38 = arith.constant 0 : index
    %89 = vector.load %arg7[%c112, %c0_38] : memref<120x512xf32, #tpu.memory_space<vmem>>, vector<8x512xf32>
    tpu.vector_store %arg7[%c112, %c0_38], %88 {strides = array<i32>} : memref<120x512xf32, #tpu.memory_space<vmem>>, vector<8x512xf32>,
    %c0_39 = arith.constant 0 : index
    %c0_40 = arith.constant 0 : index
    %90 = vector.load %arg2[%c0_39, %c0_40] : memref<32x120xbf16, #tpu.memory_space<vmem>>, vector<32x120xbf16>
    %c0_41 = arith.constant 0 : index
    %c0_42 = arith.constant 0 : index
    %91 = vector.load %arg7[%c0_41, %c0_42] : memref<120x512xf32, #tpu.memory_space<vmem>>, vector<120x512xf32>
    %92 = arith.truncf %91 : vector<120x512xf32> to vector<120x512xbf16>
    %cst_43 = arith.constant dense<0.000000e+00> : vector<32x512xf32>
    %93 = tpu.matmul %90, %92, %cst_43 {dimension_numbers = #tpu.dot_dimension_numbers<[1], [0], [0], [1], [0, 0, 1, 1], [], []>} : vector<32x120xbf16>, vector<120x512xbf16>, vector<32x512xf32> -> vector<32x512xf32>
    %c0_44 = arith.constant 0 : index
    %c0_45 = arith.constant 0 : index
    %94 = vector.load %arg3[%c0_44, %c0_45] : memref<32x512xf32, #tpu.memory_space<vmem>>, vector<32x512xf32>
    %95 = arith.addf %93, %94 : vector<32x512xf32>
    %96 = arith.mulf %95, %95 : vector<32x512xf32>
    %97 = arith.mulf %96, %95 : vector<32x512xf32>
    %cst_46 = arith.constant 4.471500e-02 : f32
    %98 = vector.broadcast %cst_46 : f32 to vector<32x512xf32>
    %99 = arith.mulf %98, %97 : vector<32x512xf32>
    %100 = arith.addf %95, %99 : vector<32x512xf32>
    %cst_47 = arith.constant 0.797884583 : f32
    %101 = vector.broadcast %cst_47 : f32 to vector<32x512xf32>
    %102 = arith.mulf %101, %100 : vector<32x512xf32>
    %cst_48 = arith.constant 5.000000e-01 : f32
    %103 = vector.broadcast %cst_48 : f32 to vector<32x512xf32>
    %104 = arith.mulf %103, %95 : vector<32x512xf32>
    %105 = math.tanh %102 : vector<32x512xf32>
    %cst_49 = arith.constant 1.000000e+00 : f32
    %106 = vector.broadcast %cst_49 : f32 to vector<32x512xf32>
    %107 = arith.addf %106, %105 : vector<32x512xf32>
    %108 = arith.mulf %104, %107 : vector<32x512xf32>
    %c0_50 = arith.constant 0 : index
    %c0_51 = arith.constant 0 : index
    %c0_52 = arith.constant 0 : index
    %109 = vector.load %arg4[%c0_50, %c0_51, %c0_52] : memref<4x32x256xf32, #tpu.memory_space<vmem>>, vector<4x32x256xf32>
    %110 = vector.extract_strided_slice %108 {offsets = [0, 0], sizes = [32, 256], strides = [1, 1]} : vector<32x512xf32> to vector<32x256xf32>
    %111 = vector.shape_cast %110 : vector<32x256xf32> to vector<1x32x256xf32>
    %112 = vector.broadcast %111 : vector<1x32x256xf32> to vector<4x32x256xf32>
    %113 = arith.mulf %112, %109 : vector<4x32x256xf32>
    %cst_53 = arith.constant dense<0.000000e+00> : vector<4x32xf32>
    %114 = vector.multi_reduction <add>, %113, %cst_53 [2] : vector<4x32x256xf32> to vector<4x32xf32>
    %cst_54 = arith.constant dense<0.000000e+00> : vector<4xf32>
    %115 = vector.multi_reduction <add>, %114, %cst_54 [1] : vector<4x32xf32> to vector<4xf32>
    %116 = vector.shape_cast %115 : vector<4xf32> to vector<1x4xf32>
    %c0_55 = arith.constant 0 : index
    %c0_56 = arith.constant 0 : index
    %117 = vector.load %arg5[%c0_55, %c0_56] : memref<1x4xf32, #tpu.memory_space<vmem>>, vector<1x4xf32>
    %118 = arith.addf %116, %117 : vector<1x4xf32>
    %c0_57 = arith.constant 0 : index
    %c0_58 = arith.constant 0 : index
    %c0_59 = arith.constant 0 : index
    %119 = vector.load %arg6[%c0_57, %c0_58, %c0_59] : memref<1x2x4xf32, #tpu.memory_space<vmem>>, vector<1x1x4xf32>
    %120 = vector.shape_cast %119 : vector<1x1x4xf32> to vector<1x4xf32>
    %121 = vector.shape_cast %118 : vector<1x4xf32> to vector<1x1x4xf32>
    tpu.vector_store %arg6[%c0_57, %c0_58, %c0_59], %121 {strides = array<i32>} : memref<1x2x4xf32, #tpu.memory_space<vmem>>, vector<1x1x4xf32>,
    %122 = vector.extract_strided_slice %108 {offsets = [0, 256], sizes = [32, 256], strides = [1, 1]} : vector<32x512xf32> to vector<32x256xf32>
    %123 = vector.shape_cast %122 : vector<32x256xf32> to vector<1x32x256xf32>
    %124 = vector.broadcast %123 : vector<1x32x256xf32> to vector<4x32x256xf32>
    %125 = arith.mulf %124, %109 : vector<4x32x256xf32>
    %cst_60 = arith.constant dense<0.000000e+00> : vector<4x32xf32>
    %126 = vector.multi_reduction <add>, %125, %cst_60 [2] : vector<4x32x256xf32> to vector<4x32xf32>
    %cst_61 = arith.constant dense<0.000000e+00> : vector<4xf32>
    %127 = vector.multi_reduction <add>, %126, %cst_61 [1] : vector<4x32xf32> to vector<4xf32>
    %128 = vector.shape_cast %127 : vector<4xf32> to vector<1x4xf32>
    %c0_62 = arith.constant 0 : index
    %c0_63 = arith.constant 0 : index
    %129 = vector.load %arg5[%c0_62, %c0_63] : memref<1x4xf32, #tpu.memory_space<vmem>>, vector<1x4xf32>
    %130 = arith.addf %128, %129 : vector<1x4xf32>
    %c0_64 = arith.constant 0 : index
    %c1 = arith.constant 1 : index
    %c0_65 = arith.constant 0 : index
    %131 = vector.load %arg6[%c0_64, %c1, %c0_65] : memref<1x2x4xf32, #tpu.memory_space<vmem>>, vector<1x1x4xf32>
    %132 = vector.shape_cast %131 : vector<1x1x4xf32> to vector<1x4xf32>
    %133 = vector.shape_cast %130 : vector<1x4xf32> to vector<1x1x4xf32>
    tpu.vector_store %arg6[%c0_64, %c1, %c0_65], %133 {strides = array<i32>} : memref<1x2x4xf32, #tpu.memory_space<vmem>>, vector<1x1x4xf32>,
    return
  }
  func.func @transform_0(%arg0: i32) -> (i32, i32, i32) {
    %c0_i32 = arith.constant 0 : i32
    %c0_i32_0 = arith.constant 0 : i32
    %c0_i32_1 = arith.constant 0 : i32
    return %arg0, %c0_i32, %c0_i32_0 : i32, i32, i32
  }
  func.func @transform_1(%arg0: i32) -> (i32, i32) {
    %c0_i32 = arith.constant 0 : i32
    %c0_i32_0 = arith.constant 0 : i32
    %c0_i32_1 = arith.constant 0 : i32
    return %c0_i32, %c0_i32_0 : i32, i32
  }
  func.func @transform_2(%arg0: i32) -> (i32, i32) {
    %c0_i32 = arith.constant 0 : i32
    %c0_i32_0 = arith.constant 0 : i32
    %c0_i32_1 = arith.constant 0 : i32
    return %c0_i32, %c0_i32_0 : i32, i32
  }
  func.func @transform_3(%arg0: i32) -> (i32, i32, i32) {
    %c0_i32 = arith.constant 0 : i32
    %c0_i32_0 = arith.constant 0 : i32
    %c0_i32_1 = arith.constant 0 : i32
    %c0_i32_2 = arith.constant 0 : i32
    return %c0_i32, %c0_i32_0, %c0_i32_1 : i32, i32, i32
  }
  func.func @transform_4(%arg0: i32) -> (i32, i32) {
    %c0_i32 = arith.constant 0 : i32
    %c0_i32_0 = arith.constant 0 : i32
    %c0_i32_1 = arith.constant 0 : i32
    return %c0_i32, %c0_i32_0 : i32, i32
  }
  func.func @transform_5(%arg0: i32) -> (i32, i32, i32) {
    %c0_i32 = arith.constant 0 : i32
    %c0_i32_0 = arith.constant 0 : i32
    %c0_i32_1 = arith.constant 0 : i32
    return %arg0, %c0_i32, %c0_i32_0 : i32, i32, i32
  }
}

</mosaic_0001>

<bundles_post_ra>
// kernel: _lambda_.1
= control target key start
LH: loop header
LB: loop body
LE: loop exit
PB: predicated region body
PF: predicated region fallthrough
CT: control target
= control target key end

     0   :  { %s1507_s26 = smov 6   ;;  %s1508_s27 = smov 7   ;;  %s2234_s0 = inlined_call_operand.vmem [shape: f32[1,8,512], index: 0, kind: input, shape index: {}]   ;;  %s2235_s1 = inlined_call_operand.vmem [shape: bf16[32,120], index: 1, kind: input, shape index: {}]   ;;  %s2236_s2 = inlined_call_operand.vmem [shape: f32[32,512], index: 2, kind: input, shape index: {}]   ;;  %s2237_s3 = inlined_call_operand.vmem [shape: f32[4,32,256], index: 3, kind: input, shape index: {}]   ;;  %s2238_s4 = inlined_call_operand.vmem [shape: f32[1,4], index: 4, kind: input, shape index: {}]   ;;  %s2239_s5 = inlined_call_operand.hbm [shape: f32[1,2,4], index: 5, kind: output, shape index: {}]  }
   0x1   :  { %v1557_v0 = vld [vmem:[%s2234_s0] sm:$0xff]  ;;  %v1562_v1 = vld [vmem:[%s2234_s0 + $0x8] sm:$0xff]  ;;  %v1567_v2 = vld [vmem:[%s2234_s0 + $0x10] sm:$0xff] }
   0x2   :  { %v1317_v3 = vpack.i.bf16 %v1562_v1, %v1557_v0  ;;  %v1574_v4 = vld [vmem:[%s2234_s0 + $0x18] sm:$0xff] }
   0x3   :  { %v1322_v5 = vpack.i.bf16 %v1574_v4, %v1567_v2 }
   0x4   :  { %1318 = vrot.lane.b32.xlu1 %v1317_v3, %s1507_s26  ;;  %1308 = vrot.lane.b32.xlu0 %v1317_v3, %s1508_s27 }
   0x5   :  { %10 = vsyncpa [#allocation4], 0  ;;  %s1509_s28 = smov 5   ;;  %s1510_s29 = smov 4   ;;  %v1519_v6 = vmov 0   ;;  %v26_v7 = vlaneseq }
   0x6   :  { %s1511_s30 = smov 3   ;;  %s1512_s0 = smov 2   ;;  %563 = vmatprep.mubr.bf16.mxu0 %v1519_v6  ;;  %616 = vmatprep.mubr.bf16.mxu1 %v1519_v6 }
   0x7   :  { %s1513_s6 = smov 1   ;;  %s1514_s7 = smov 127   ;;  %1447 = vset.pattern.permute.xlu1 %v1519_v6  ;;  %1448 = vset.pattern.permute.xlu0 %v1519_v6  ;;  %v1583_v8 = vand.u32 127, %v26_v7 }
   0x8   :  { %1323 = vrot.lane.b32.xlu1 %v1322_v5, %s1507_s26  ;;  %1313 = vrot.lane.b32.xlu0 %v1322_v5, %s1508_s27  ;;  %s1515_s8 = smov 126   ;;  %s1516_s9 = smov 125  }
   0x9   :  { %s1517_s10 = smov 124   ;;  %s1518_s11 = smov 123   ;;  %v29_v9 = vadd.s32 256, %v1583_v8  ;;  %vm43_vm0 = vcmp.lt.s32.totalorder %v1583_v8, 7  ;;  %vm68_vm1 = vcmp.lt.s32.totalorder %v1583_v8, 6  ;;  %v1589_v12 = vand.u32 255, %v1583_v8 }
   0xa   :  { %s1520_s12 = smov 122   ;;  %s1521_s13 = smov 121   ;;  %vm93_vm8 = vcmp.lt.s32.totalorder %v1583_v8, 5  ;;  %vm118_vm9 = vcmp.lt.s32.totalorder %v1583_v8, 4 }
   0xb   :  { %v1591_v17 = vand.u32 255, %v29_v9  ;;  %vm48_vm2 = vcmp.ge.s32.totalorder %v1589_v12, 7  ;;  %vm73_vm3 = vcmp.ge.s32.totalorder %v1589_v12, 6  ;;  %vm98_vm10 = vcmp.ge.s32.totalorder %v1589_v12, 5 }
   0xc   :  { %1333 = vrot.lane.b32.xlu1 %v1322_v5, %s1509_s28  ;;  %1328 = vrot.lane.b32.xlu0 %v1317_v3, %s1509_s28  ;;  %vm1248_vm6 = vmpackc.low %vm73_vm3, %vm48_vm2  ;;  %vm123_vm11 = vcmp.ge.s32.totalorder %v1589_v12, 4  ;;  %vm193_vm2 = vcmp.lt.s32.totalorder %v1583_v8, 1  ;;  %vm148_vm3 = vcmp.ge.s32.totalorder %v1589_v12, 3 }
   0xd   :  { %vm50_vm4 = vcmp.ge.s32.totalorder %v1591_v17, 7  ;;  %vm75_vm5 = vcmp.ge.s32.totalorder %v1591_v17, 6  ;;  %vm100_vm12 = vcmp.ge.s32.totalorder %v1591_v17, 5  ;;  %vm125_vm13 = vcmp.ge.s32.totalorder %v1591_v17, 4  ;;  %vm1639_vm14 = vmpackc.low %vm123_vm11, %vm98_vm10 }
   0xe   :  { %vm1269_vm7 = vmpackc.low %vm75_vm5, %vm50_vm4  ;;  %vm173_vm4 = vcmp.ge.s32.totalorder %v1589_v12, 2  ;;  %vm150_vm5 = vcmp.ge.s32.totalorder %v1591_v17, 3  ;;  %vm200_vm10 = vcmp.ge.s32.totalorder %v1591_v17, 1  ;;  %vm1522_vm11 = vmmov 1  }
   0xf   :  { %vm1272_vm15 = vmpackc.low %vm125_vm13, %vm100_vm12 }
  0x10   :  { %1343 = vrot.lane.b32.xlu1 %v1322_v5, %s1510_s29  ;;  %1338 = vrot.lane.b32.xlu0 %v1317_v3, %s1510_s29  ;;  %vm1278_vm13 = vmpackc.low %vm1522_vm11, %vm200_vm10 }
  0x14   :  { %1353 = vrot.lane.b32.xlu1 %v1322_v5, %s1511_s30  ;;  %1348 = vrot.lane.b32.xlu0 %v1317_v3, %s1511_s30  ;;  %s1523_s30 = smov [#allocation3]  }
  0x18   :  { %1363 = vrot.lane.b32.xlu1 %v1322_v5, %s1512_s0  ;;  %1358 = vrot.lane.b32.xlu0 %v1317_v3, %s1512_s0  ;;  %s1230_s0 = sshll.u32 %s1523_s30, 4  ;;  %s1231_s0 = int_to_ptr.vmem [resolvable:$true] %s1230_s0 }
  0x19   :  { %p1488_p1 = scmp.lt.s32.totalorder %s1231_s0, %s1231_s0 }
  0x1c   :  { %1373 = vrot.lane.b32.xlu1 %v1322_v5, %s1513_s6  ;;  %1368 = vrot.lane.b32.xlu0 %v1317_v3, %s1513_s6 }
  0x20   :  { %1383 = vrot.lane.b32.xlu1 %v1322_v5, %s1514_s7  ;;  %1378 = vrot.lane.b32.xlu0 %v1317_v3, %s1514_s7 }
  0x24   :  { %1393 = vrot.lane.b32.xlu1 %v1322_v5, %s1515_s8  ;;  %1388 = vrot.lane.b32.xlu0 %v1317_v3, %s1515_s8 }
  0x28   :  { %1403 = vrot.lane.b32.xlu1 %v1322_v5, %s1516_s9  ;;  %1398 = vrot.lane.b32.xlu0 %v1317_v3, %s1516_s9 }
  0x2c   :  { %1413 = vrot.lane.b32.xlu1 %v1322_v5, %s1517_s10  ;;  %1408 = vrot.lane.b32.xlu0 %v1317_v3, %s1517_s10 }
  0x30   :  { %1423 = vrot.lane.b32.xlu1 %v1322_v5, %s1518_s11  ;;  %1418 = vrot.lane.b32.xlu0 %v1317_v3, %s1518_s11 }
  0x34   :  { %1433 = vrot.lane.b32.xlu1 %v1322_v5, %s1520_s12  ;;  %1428 = vrot.lane.b32.xlu0 %v1317_v3, %s1520_s12 }
  0x38   :  { %1443 = vrot.lane.b32.xlu1 %v1322_v5, %s1521_s13  ;;  %1438 = vrot.lane.b32.xlu0 %v1317_v3, %s1521_s13 }
  0x76   :  { %v1319_v10 = vpop.permute.xlu1 %1318  ;;  %v1309_v11 = vpop.permute.xlu0 %1308 }
  0x77   :  { %v1321_v13 = vunpack.i.h.bf16 %v1319_v10  ;;  %v1320_v14 = vunpack.i.l.bf16 %v1319_v10  ;;  %v1311_v15 = vunpack.i.h.bf16 %v1309_v11  ;;  %v1310_v16 = vunpack.i.l.bf16 %v1309_v11 }
  0x79   :  { %v46_v18 = vsel %vm43_vm0, %v1310_v16, %v1311_v15  ;;  %v71_v19 = vsel %vm68_vm1, %v1320_v14, %v1321_v13 }
  0x7a   :  { %v1324_v20 = vpop.permute.xlu1 %1323  ;;  %v1314_v21 = vpop.permute.xlu0 %1313  ;;  %v454_v22 = vpack.c.bf16 %v71_v19, %v46_v18 }
  0x7b   :  { %v1326_v23 = vunpack.i.h.bf16 %v1324_v20  ;;  %v1325_v24 = vunpack.i.l.bf16 %v1324_v20  ;;  %v1316_v25 = vunpack.i.h.bf16 %v1314_v21  ;;  %v1315_v26 = vunpack.i.l.bf16 %v1314_v21 }
  0x7c   :  { %531 = vmatprep.subr.bf16.mxu0 %v454_v22 }
  0x7d   :  { %v47_v27 = vsel %vm43_vm0, %v1316_v25, %v1310_v16  ;;  %v72_v28 = vsel %vm68_vm1, %v1326_v23, %v1320_v14  ;;  %v44_v29 = vsel %vm43_vm0, %v1315_v26, %v1316_v25  ;;  %v69_v30 = vsel %vm68_vm1, %v1325_v24, %v1326_v23 }
  0x7e   :  { %v1334_v31 = vpop.permute.xlu1 %1333  ;;  %v1329_v32 = vpop.permute.xlu0 %1328  ;;  %v1249_v33 = vpack.c.bf16 %v72_v28, %v47_v27  ;;  %v456_v34 = vpack.c.bf16 %v69_v30, %v44_v29  ;;  %v45_v35 = vsel %vm43_vm0, %v1311_v15, %v1315_v26  ;;  %v70_v36 = vsel %vm68_vm1, %v1321_v13, %v1325_v24 }
  0x7f   :  { %v1336_v37 = vunpack.i.h.bf16 %v1334_v31  ;;  %v1335_v38 = vunpack.i.l.bf16 %v1334_v31  ;;  %v1331_v39 = vunpack.i.h.bf16 %v1329_v32  ;;  %v1330_v40 = vunpack.i.l.bf16 %v1329_v32 }
  0x80   :  { %1250 = vmatpush1.bf16.msk.msra.mxu0 %vm1248_vm6, %v1249_v33  ;;  %584 = vmatprep.subr.bf16.mxu1 %v456_v34  ;;  %v1270_v41 = vpack.c.bf16 %v70_v36, %v45_v35  ;;  %vm143_vm0 = vcmp.lt.s32.totalorder %v1583_v8, 3  ;;  %vm168_vm1 = vcmp.lt.s32.totalorder %v1583_v8, 2  ;;  %vm175_vm6 = vcmp.ge.s32.totalorder %v1591_v17, 2 }
  0x81   :  { %v95_v48 = vsel %vm93_vm8, %v1331_v39, %v1335_v38  ;;  %v97_v49 = vsel %vm93_vm8, %v1336_v37, %v1330_v40  ;;  %v96_v50 = vsel %vm93_vm8, %v1330_v40, %v1331_v39  ;;  %v94_v51 = vsel %vm93_vm8, %v1335_v38, %v1336_v37  ;;  %vm1679_vm8 = vmpackc.low %vm173_vm4, %vm148_vm3 }
  0x82   :  { %1271 = vmatpush1.bf16.msk.msra.mxu1 %vm1269_vm7, %v1270_v41  ;;  %v1344_v42 = vpop.permute.xlu1 %1343  ;;  %v1339_v43 = vpop.permute.xlu0 %1338  ;;  %vm198_vm7 = vcmp.ge.s32.totalorder %v1589_v12, 1  ;;  %v28_v13 = vadd.s32 128, %v1583_v8  ;;  %v30_v14 = vadd.s32 384, %v1583_v8 }
  0x83   :  { %v1346_v44 = vunpack.i.h.bf16 %v1344_v42  ;;  %v1345_v45 = vunpack.i.l.bf16 %v1344_v42  ;;  %v1341_v46 = vunpack.i.h.bf16 %v1339_v43  ;;  %v1340_v47 = vunpack.i.l.bf16 %v1339_v43  ;;  %vm1257_vm12 = vmpackc.low %vm1522_vm11, %vm198_vm7 }
  0x84   :  { %v1696_v42 = vand.u32 255, %v28_v13 }
  0x85   :  { %v120_v52 = vsel %vm118_vm9, %v1341_v46, %v1345_v45  ;;  %v122_v53 = vsel %vm118_vm9, %v1346_v44, %v1340_v47  ;;  %v121_v54 = vsel %vm118_vm9, %v1340_v47, %v1341_v46  ;;  %v119_v55 = vsel %vm118_vm9, %v1345_v45, %v1346_v44  ;;  %vm1275_vm9 = vmpackc.low %vm175_vm6, %vm150_vm5 }
  0x86   :  { %v1252_v57 = vpack.c.bf16 %v122_v53, %v97_v49  ;;  %v1273_v58 = vpack.c.bf16 %v120_v52, %v95_v48  ;;  %v1354_v59 = vpop.permute.xlu1 %1353  ;;  %v1349_v60 = vpop.permute.xlu0 %1348  ;;  %v458_v61 = vpack.c.bf16 %v121_v54, %v96_v50  ;;  %v460_v62 = vpack.c.bf16 %v119_v55, %v94_v51 }
  0x87   :  { %v1356_v63 = vunpack.i.h.bf16 %v1354_v59  ;;  %v1355_v3 = vunpack.i.l.bf16 %v1354_v59  ;;  %v1351_v5 = vunpack.i.h.bf16 %v1349_v60  ;;  %v1350_v9 = vunpack.i.l.bf16 %v1349_v60 }
  0x88   :  { %533 = vmatprep.subr.bf16.mxu0 %v458_v61  ;;  %586 = vmatprep.subr.bf16.mxu1 %v460_v62  ;;  %v1704_v48 = vand.u32 255, %v30_v14  ;;  %vm272_vm6 = vcmp.lt.s32.totalorder %v1583_v8, 125  ;;  %vm278_vm7 = vcmp.lt.s32.totalorder %v1696_v42, 253 }
  0x89   :  { %1253 = vmatpush1.bf16.msk.msra.mxu0 %vm1639_vm14, %v1252_v57  ;;  %1274 = vmatpush1.bf16.msk.msra.mxu1 %vm1272_vm15, %v1273_v58  ;;  %v145_v20 = vsel %vm143_vm0, %v1351_v5, %v1355_v3  ;;  %v147_v21 = vsel %vm143_vm0, %v1356_v63, %v1350_v9  ;;  %v146_v22 = vsel %vm143_vm0, %v1350_v9, %v1351_v5  ;;  %vm222_vm14 = vcmp.lt.s32.totalorder %v1583_v8, 127 }
  0x8a   :  { %v1364_v10 = vpop.permute.xlu1 %1363  ;;  %v1359_v11 = vpop.permute.xlu0 %1358  ;;  %v144_v23 = vsel %vm143_vm0, %v1355_v3, %v1356_v63  ;;  %vm228_vm15 = vcmp.lt.s32.totalorder %v1696_v42, 255  ;;  %vm253_vm0 = vcmp.lt.s32.totalorder %v1696_v42, 254  ;;  %vm255_vm3 = vcmp.lt.s32.totalorder %v1704_v48, 254 }
  0x8b   :  { %v1366_v15 = vunpack.i.h.bf16 %v1364_v10  ;;  %v1365_v16 = vunpack.i.l.bf16 %v1364_v10  ;;  %v1361_v18 = vunpack.i.h.bf16 %v1359_v11  ;;  %v1360_v19 = vunpack.i.l.bf16 %v1359_v11  ;;  %vm1722_vm4 = vmpackc.low %vm253_vm0, %vm228_vm15 }
  0x8c   :  { %vm280_vm10 = vcmp.lt.s32.totalorder %v1704_v48, 253  ;;  %vm305_vm11 = vcmp.lt.s32.totalorder %v1704_v48, 252  ;;  %vm347_vm15 = vcmp.lt.s32.totalorder %v1583_v8, 122  ;;  %vm372_vm0 = vcmp.lt.s32.totalorder %v1583_v8, 121 }
  0x8d   :  { %v170_v24 = vsel %vm168_vm1, %v1361_v18, %v1365_v16  ;;  %v172_v25 = vsel %vm168_vm1, %v1366_v15, %v1360_v19  ;;  %v171_v26 = vsel %vm168_vm1, %v1360_v19, %v1361_v18  ;;  %v169_v27 = vsel %vm168_vm1, %v1365_v16, %v1366_v15 }
  0x8e   :  { %v1255_v29 = vpack.c.bf16 %v172_v25, %v147_v21  ;;  %v1276_v30 = vpack.c.bf16 %v170_v24, %v145_v20  ;;  %v1374_v31 = vpop.permute.xlu1 %1373  ;;  %v1369_v32 = vpop.permute.xlu0 %1368  ;;  %v462_v33 = vpack.c.bf16 %v171_v26, %v146_v22  ;;  %v464_v34 = vpack.c.bf16 %v169_v27, %v144_v23 }
  0x8f   :  { %v1376_v35 = vunpack.i.h.bf16 %v1374_v31  ;;  %v1375_v36 = vunpack.i.l.bf16 %v1374_v31  ;;  %v1371_v37 = vunpack.i.h.bf16 %v1369_v32  ;;  %v1370_v38 = vunpack.i.l.bf16 %v1369_v32 }
  0x90   :  { %535 = vmatprep.subr.bf16.mxu0 %v462_v33  ;;  %588 = vmatprep.subr.bf16.mxu1 %v464_v34  ;;  %vm247_vm1 = vcmp.lt.s32.totalorder %v1583_v8, 126 }
  0x91   :  { %v195_v39 = vsel %vm193_vm2, %v1371_v37, %v1375_v36  ;;  %v197_v40 = vsel %vm193_vm2, %v1376_v35, %v1370_v38  ;;  %1256 = vmatpush1.bf16.msk.msra.mxu0 %vm1679_vm8, %v1255_v29  ;;  %1277 = vmatpush1.bf16.msk.msra.mxu1 %vm1275_vm9, %v1276_v30  ;;  %v196_v41 = vsel %vm193_vm2, %v1370_v38, %v1371_v37  ;;  %vm303_vm8 = vcmp.lt.s32.totalorder %v1696_v42, 252 }
  0x92   :  { %v1258_v43 = vpack.c.bf16 %v1557_v0, %v197_v40  ;;  %v1384_v44 = vpop.permute.xlu1 %1383  ;;  %v1379_v45 = vpop.permute.xlu0 %1378  ;;  %v466_v46 = vpack.c.bf16 %v1562_v1, %v196_v41  ;;  %v194_v47 = vsel %vm193_vm2, %v1375_v36, %v1376_v35  ;;  %v1279_v49 = vpack.c.bf16 %v1567_v2, %v195_v39 }
  0x93   :  { %v1386_v50 = vunpack.i.h.bf16 %v1384_v44  ;;  %v1385_v51 = vunpack.i.l.bf16 %v1384_v44  ;;  %v1381_v52 = vunpack.i.h.bf16 %v1379_v45  ;;  %v1380_v53 = vunpack.i.l.bf16 %v1379_v45 }
  0x94   :  { %537 = vmatprep.subr.bf16.mxu0 %v466_v46  ;;  %v468_v0 = vpack.c.bf16 %v1574_v4, %v194_v47  ;;  %vm230_vm2 = vcmp.lt.s32.totalorder %v1704_v48, 255  ;;  %vm297_vm9 = vcmp.lt.s32.totalorder %v1583_v8, 124 }
  0x95   :  { %1259 = vmatpush1.bf16.msk.msra.mxu0 %vm1257_vm12, %v1258_v43  ;;  %v224_v55 = vsel %vm222_vm14, %v1381_v52, %v1385_v51  ;;  %v226_v56 = vsel %vm222_vm14, %v1386_v50, %v1380_v53  ;;  %v225_v58 = vsel %vm222_vm14, %v1380_v53, %v1381_v52  ;;  %v223_v59 = vsel %vm222_vm14, %v1385_v51, %v1386_v50  ;;  %vm1281_vm5 = vmpackc.low %vm255_vm3, %vm230_vm2 }
  0x96   :  { %590 = vmatprep.subr.bf16.mxu1 %v468_v0  ;;  %v1394_v1 = vpop.permute.xlu1 %1393  ;;  %v1389_v2 = vpop.permute.xlu0 %1388  ;;  %vm1750_vm12 = vmpackc.low %vm303_vm8, %vm278_vm7  ;;  %vm322_vm14 = vcmp.lt.s32.totalorder %v1583_v8, 123  ;;  %vm353_vm2 = vcmp.lt.s32.totalorder %v1696_v42, 250  ;;  %vm378_vm3 = vcmp.lt.s32.totalorder %v1696_v42, 249 }
  0x97   :  { %1280 = vmatpush1.bf16.msk.msra.mxu1 %vm1278_vm13, %v1279_v49  ;;  %v1396_v4 = vunpack.i.h.bf16 %v1394_v1  ;;  %v1395_v12 = vunpack.i.l.bf16 %v1394_v1  ;;  %v1391_v17 = vunpack.i.h.bf16 %v1389_v2  ;;  %v1390_v54 = vunpack.i.l.bf16 %v1389_v2  ;;  %vm1284_vm13 = vmpackc.low %vm305_vm11, %vm280_vm10 }
  0x98   :  { %vm511_vm10 = vcmask 982016   ;;  %vm918_vm11 = vcmask 130112  }
  0x99   :  { %v249_v60 = vsel %vm247_vm1, %v1391_v17, %v1395_v12  ;;  %v251_v61 = vsel %vm247_vm1, %v1396_v4, %v1390_v54  ;;  %v250_v62 = vsel %vm247_vm1, %v1390_v54, %v1391_v17  ;;  %v248_v63 = vsel %vm247_vm1, %v1395_v12, %v1396_v4 }
  0x9a   :  { %v1261_v3 = vpack.c.bf16 %v249_v60, %v224_v55  ;;  %v1282_v5 = vpack.c.bf16 %v251_v61, %v226_v56  ;;  %v1404_v9 = vpop.permute.xlu1 %1403  ;;  %v1399_v10 = vpop.permute.xlu0 %1398  ;;  %v469_v11 = vpack.c.bf16 %v250_v62, %v225_v58  ;;  %v471_v13 = vpack.c.bf16 %v248_v63, %v223_v59 }
  0x9b   :  { %v1406_v14 = vunpack.i.h.bf16 %v1404_v9  ;;  %v1405_v15 = vunpack.i.l.bf16 %v1404_v9  ;;  %v1401_v16 = vunpack.i.h.bf16 %v1399_v10  ;;  %v1400_v18 = vunpack.i.l.bf16 %v1399_v10 }
  0x9c   :  { %1262 = vmatprep.subr.msk.bf16.mxu0 %vm1722_vm4, %v1261_v3  ;;  %1283 = vmatprep.subr.msk.bf16.mxu1 %vm1281_vm5, %v1282_v5  ;;  %vm328_vm1 = vcmp.lt.s32.totalorder %v1696_v42, 251  ;;  %vm380_vm4 = vcmp.lt.s32.totalorder %v1704_v48, 249  ;;  %vm330_vm5 = vcmp.lt.s32.totalorder %v1704_v48, 251  ;;  %v1450_v42 = vld [vmem:[%s2235_s1 + $0x8] sm:$0xff]  }
  0x9d   :  { %540 = vmatpush1.bf16.msra.mxu0 %v469_v11  ;;  %593 = vmatpush1.bf16.msra.mxu1 %v471_v13  ;;  %v274_v25 = vsel %vm272_vm6, %v1401_v16, %v1405_v15  ;;  %v276_v26 = vsel %vm272_vm6, %v1406_v14, %v1400_v18  ;;  %v275_v28 = vsel %vm272_vm6, %v1400_v18, %v1401_v16  ;;  %vm1781_vm7 = vmpackc.low %vm353_vm2, %vm328_vm1  ;;  %vm998_vm1 = vcmask 257024  }
  0x9e   :  { %v1414_v19 = vpop.permute.xlu1 %1413  ;;  %v1409_v20 = vpop.permute.xlu0 %1408  ;;  %v273_v29 = vsel %vm272_vm6, %v1405_v15, %v1406_v14  ;;  %vm355_vm6 = vcmp.lt.s32.totalorder %v1704_v48, 250  ;;  %v485_v48 = vld [vmem:[%s2236_s2] sm:$0xff]  ;;  %vm1022_vm2 = vcmask 24576  }
  0x9f   :  { %v1416_v21 = vunpack.i.h.bf16 %v1414_v19  ;;  %v1415_v22 = vunpack.i.l.bf16 %v1414_v19  ;;  %v1411_v23 = vunpack.i.h.bf16 %v1409_v20  ;;  %v1410_v24 = vunpack.i.l.bf16 %v1409_v20  ;;  %vm1287_vm8 = vmpackc.low %vm355_vm6, %vm330_vm5 }
  0xa1   :  { %v299_v30 = vsel %vm297_vm9, %v1411_v23, %v1415_v22  ;;  %v301_v31 = vsel %vm297_vm9, %v1416_v21, %v1410_v24  ;;  %v300_v32 = vsel %vm297_vm9, %v1410_v24, %v1411_v23  ;;  %v298_v33 = vsel %vm297_vm9, %v1415_v22, %v1416_v21  ;;  %v1449_v22 = vld [vmem:[%s2235_s1] sm:$0xff]   ;;  %v487_v23 = vld [vmem:[%s2236_s2 + $0x10] sm:$0xff]  ;;  %v486_v24 = vld [vmem:[%s2236_s2 + $0x8] sm:$0xff] }
  0xa2   :  { %v1264_v34 = vpack.c.bf16 %v299_v30, %v274_v25  ;;  %v1285_v35 = vpack.c.bf16 %v301_v31, %v276_v26  ;;  %v1424_v36 = vpop.permute.xlu1 %1423  ;;  %v1419_v37 = vpop.permute.xlu0 %1418  ;;  %v473_v38 = vpack.c.bf16 %v300_v32, %v275_v28  ;;  %v475_v39 = vpack.c.bf16 %v298_v33, %v273_v29  ;;  %v489_v33 = vld [vmem:[%s2236_s2 + $0x20] sm:$0xff] }
  0xa3   :  { %v1426_v40 = vunpack.i.h.bf16 %v1424_v36  ;;  %v1425_v41 = vunpack.i.l.bf16 %v1424_v36  ;;  %v1421_v43 = vunpack.i.h.bf16 %v1419_v37  ;;  %v1420_v44 = vunpack.i.l.bf16 %v1419_v37 }
  0xa4   :  { %1265 = vmatprep.subr.msk.bf16.mxu0 %vm1750_vm12, %v1264_v34  ;;  %1286 = vmatprep.subr.msk.bf16.mxu1 %vm1284_vm13, %v1285_v35  ;;  %vm518_vm9 = vcmask 1043456   ;;  %v491_v35 = vld [vmem:[%s2236_s2 + $0x30] sm:$0xff]  ;;  %vm925_vm12 = vcmask 195712   ;;  %vm932_vm13 = vcmask 261312  }
  0xa5   :  { %542 = vmatpush1.bf16.msra.mxu0 %v473_v38  ;;  %595 = vmatpush1.bf16.msra.mxu1 %v475_v39  ;;  %v324_v52 = vsel %vm322_vm14, %v1421_v43, %v1425_v41  ;;  %v326_v53 = vsel %vm322_vm14, %v1426_v40, %v1420_v44  ;;  %v325_v1 = vsel %vm322_vm14, %v1420_v44, %v1421_v43  ;;  %v492_v44 = vld [vmem:[%s2236_s2 + $0x38] sm:$0xff] }
  0xa6   :  { %v1434_v45 = vpop.permute.xlu1 %1433  ;;  %v1429_v46 = vpop.permute.xlu0 %1428  ;;  %v323_v2 = vsel %vm322_vm14, %v1425_v41, %v1426_v40  ;;  %v490_v41 = vld [vmem:[%s2236_s2 + $0x28] sm:$0xff]  ;;  %vm991_vm14 = vcmask 1041409  }
  0xa7   :  { %v1436_v47 = vunpack.i.h.bf16 %v1434_v45  ;;  %v1435_v49 = vunpack.i.l.bf16 %v1434_v45  ;;  %v1431_v50 = vunpack.i.h.bf16 %v1429_v46  ;;  %v1430_v51 = vunpack.i.l.bf16 %v1429_v46 }
  0xa9   :  { %v349_v4 = vsel %vm347_vm15, %v1431_v50, %v1435_v49  ;;  %v351_v12 = vsel %vm347_vm15, %v1436_v47, %v1430_v51  ;;  %v350_v17 = vsel %vm347_vm15, %v1430_v51, %v1431_v50  ;;  %v348_v54 = vsel %vm347_vm15, %v1435_v49, %v1436_v47 }
  0xaa   :  { %v1267_v55 = vpack.c.bf16 %v349_v4, %v324_v52  ;;  %v1288_v56 = vpack.c.bf16 %v351_v12, %v326_v53  ;;  %v1444_v57 = vpop.permute.xlu1 %1443  ;;  %v1439_v58 = vpop.permute.xlu0 %1438  ;;  %v477_v59 = vpack.c.bf16 %v350_v17, %v325_v1  ;;  %v479_v60 = vpack.c.bf16 %v348_v54, %v323_v2 }
  0xab   :  { %v1446_v61 = vunpack.i.h.bf16 %v1444_v57  ;;  %v1445_v62 = vunpack.i.l.bf16 %v1444_v57  ;;  %v1441_v63 = vunpack.i.h.bf16 %v1439_v58  ;;  %v1440_v3 = vunpack.i.l.bf16 %v1439_v58 }
  0xac   :  { %1268 = vmatprep.subr.msk.bf16.mxu0 %vm1781_vm7, %v1267_v55  ;;  %1289 = vmatprep.subr.msk.bf16.mxu1 %vm1287_vm8, %v1288_v56  ;;  %vm993_vm15 = vcmask 1042434  }
  0xad   :  { %v374_v5 = vsel %vm372_vm0, %v1441_v63, %v1445_v62  ;;  %v376_v9 = vsel %vm372_vm0, %v1446_v61, %v1440_v3  ;;  %544 = vmatpush1.bf16.msra.mxu0 %v477_v59  ;;  %597 = vmatpush1.bf16.msra.mxu1 %v479_v60  ;;  %v375_v10 = vsel %vm372_vm0, %v1440_v3, %v1441_v63 }
  0xae   :  { %v382_v11 = vsel %vm378_vm3, %v374_v5, 0.0  ;;  %v384_v13 = vsel %vm380_vm4, %v376_v9, 0.0  ;;  %v481_v14 = vpack.c.bf16 %v375_v10, %v375_v10  ;;  %v373_v15 = vsel %vm372_vm0, %v1445_v62, %v1446_v61 }
  0xaf   :  { %v482_v16 = vpack.c.bf16 %v382_v11, %v382_v11  ;;  %v484_v18 = vpack.c.bf16 %v384_v13, %v384_v13  ;;  %v483_v19 = vpack.c.bf16 %v373_v15, %v373_v15  ;;  %vm995_vm0 = vcmask 1043459  }
  0xb0   :  { %v520_v20 = vsel %vm518_vm9, %v481_v14, 0 }
  0xb1   :  { %1240 = vmatprep.subr.msk.bf16.mxu0 %vm518_vm9, %v482_v16  ;;  %1243 = vmatprep.subr.msk.bf16.mxu1 %vm518_vm9, %v484_v18  ;;  %v526_v21 = vsel %vm518_vm9, %v483_v19, 0  ;;  %v493_v16 = vld [vmem:[%s2236_s2 + $0x40] sm:$0xff]  ;;  %v494_v18 = vld [vmem:[%s2236_s2 + $0x48] sm:$0xff] }
  0xb2   :  { %546 = vmatpush1.bf16.msra.mxu0 %v520_v20  ;;  %599 = vmatpush1.bf16.msra.mxu1 %v526_v21 }
  0xb5   :  { %1241 = vmatmul.mubr.msk.bf16.vlgmr.msra.gmra.mrb[0].mxu0 %vm511_vm10, %v1449_v22  ;;  %1244 = vmatmul.mubr.msk.bf16.vlgmr.msra.gmra.mrb[0].mxu1 %vm511_vm10, %v1449_v22 }
  0xb6   :  { %573 = vmatprep.mubr.bf16.mxu0 %v1519_v6  ;;  %626 = vmatprep.mubr.bf16.mxu1 %v1519_v6  ;;  %v488_v6 = vld [vmem:[%s2236_s2 + $0x18] sm:$0xff] }
  0xbd   :  { %1242 = vmatmul.mubr.msk.bf16.gmra.mrb[4].mxu0 %vm511_vm10, %v1450_v42  ;;  %1245 = vmatmul.mubr.msk.bf16.gmra.mrb[4].mxu1 %vm511_vm10, %v1450_v42 }
 0x188   :  { %v565_v25 = vpop.f32.mrb[0].mxu0  ;;  %v618_v26 = vpop.f32.mrb[0].mxu1 }
 0x189   :  { %v566_v27 = vadd.f32 %v565_v25, %v485_v48  ;;  %v619_v28 = vadd.f32 %v618_v26, %v487_v23  ;;  %v567_v29 = vpop.f32.mrb[1].mxu0  ;;  %v620_v30 = vpop.f32.mrb[1].mxu1 }
 0x18a   :  { %v568_v31 = vadd.f32 %v567_v29, %v486_v24  ;;  %v621_v32 = vadd.f32 %v620_v30, %v488_v6  ;;  %v569_v34 = vpop.f32.mrb[2].mxu0  ;;  %v622_v36 = vpop.f32.mrb[2].mxu1 }
 0x18b   :  { %v637_v37 = vmul.f32 %v566_v27, %v566_v27  ;;  %v1837_v38 = vmul.f32 0.5, %v566_v27  ;;  %v639_v39 = vmul.f32 %v619_v28, %v619_v28  ;;  %v1839_v40 = vmul.f32 0.5, %v619_v28  ;;  %v571_v43 = vpop.f32.mrb[3].mxu0  ;;  %v624_v45 = vpop.f32.mrb[3].mxu1 }
 0x18c   :  { %v638_v46 = vmul.f32 %v568_v31, %v568_v31  ;;  %v1847_v47 = vmul.f32 0.5, %v568_v31  ;;  %v640_v49 = vmul.f32 %v621_v32, %v621_v32  ;;  %v1849_v50 = vmul.f32 0.5, %v621_v32 }
 0x18d   :  { %v653_v51 = vmul.f32 %v637_v37, %v566_v27  ;;  %v655_v52 = vmul.f32 %v639_v39, %v619_v28  ;;  %v570_v53 = vadd.f32 %v569_v34, %v489_v33  ;;  %v623_v0 = vadd.f32 %v622_v36, %v491_v35 }
 0x18e   :  { %v654_v1 = vmul.f32 %v638_v46, %v568_v31  ;;  %v656_v2 = vmul.f32 %v640_v49, %v621_v32  ;;  %v572_v4 = vadd.f32 %v571_v43, %v490_v41  ;;  %v625_v12 = vadd.f32 %v624_v45, %v492_v44  ;;  %v497_v44 = vld [vmem:[%s2236_s2 + $0x60] sm:$0xff]  ;;  %v498_v45 = vld [vmem:[%s2236_s2 + $0x68] sm:$0xff] }
 0x18f   :  { %v669_v17 = vmul.f32 0.044715, %v653_v51  ;;  %v671_v54 = vmul.f32 0.044715, %v655_v52  ;;  %v641_v55 = vmul.f32 %v570_v53, %v570_v53  ;;  %v1851_v56 = vmul.f32 0.5, %v570_v53  ;;  %v495_v52 = vld [vmem:[%s2236_s2 + $0x50] sm:$0xff] }
 0x190   :  { %v670_v57 = vmul.f32 0.044715, %v654_v1  ;;  %v672_v58 = vmul.f32 0.044715, %v656_v2  ;;  %v643_v59 = vmul.f32 %v623_v0, %v623_v0  ;;  %v1853_v60 = vmul.f32 0.5, %v623_v0  ;;  %v575_v61 = vpop.f32.mrb[4].mxu0 }
 0x191   :  { %v685_v62 = vadd.f32 %v669_v17, %v566_v27  ;;  %v687_v63 = vadd.f32 %v671_v54, %v619_v28  ;;  %v657_v3 = vmul.f32 %v641_v55, %v570_v53  ;;  %v642_v5 = vmul.f32 %v572_v4, %v572_v4  ;;  %v577_v9 = vpop.f32.mrb[5].mxu0  ;;  %v628_v10 = vpop.f32.mrb[4].mxu1 }
 0x192   :  { %v686_v11 = vadd.f32 %v670_v57, %v568_v31  ;;  %v688_v13 = vadd.f32 %v672_v58, %v621_v32  ;;  %v659_v14 = vmul.f32 %v643_v59, %v623_v0  ;;  %v1855_v15 = vmul.f32 0.5, %v572_v4  ;;  %v579_v19 = vpop.f32.mrb[6].mxu0  ;;  %v630_v20 = vpop.f32.mrb[5].mxu1 }
 0x193   :  { %v701_v21 = vmul.f32 0.7978846, %v685_v62  ;;  %v703_v22 = vmul.f32 0.7978846, %v687_v63  ;;  %v673_v42 = vmul.f32 0.044715, %v657_v3  ;;  %v658_v48 = vmul.f32 %v642_v5, %v572_v4 }
 0x194   :  { %v702_v23 = vmul.f32 0.7978846, %v686_v11  ;;  %v704_v24 = vmul.f32 0.7978846, %v688_v13  ;;  %v675_v6 = vmul.f32 0.044715, %v659_v14  ;;  %v644_v25 = vmul.f32 %v625_v12, %v625_v12 }
 0x195   :  { %1451 = vtanh.f32 %v701_v21  ;;  %v689_v26 = vadd.f32 %v673_v42, %v570_v53  ;;  %v674_v27 = vmul.f32 0.044715, %v658_v48  ;;  %v1863_v28 = vmul.f32 0.5, %v625_v12  ;;  %v581_v29 = vpop.f32.mrb[7].mxu0  ;;  %v1865_v30 = vpop.f32.mrb[6].mxu1  ;;  %v496_v53 = vld [vmem:[%s2236_s2 + $0x58] sm:$0xff] }
 0x196   :  { %1453 = vtanh.f32 %v703_v22  ;;  %v691_v31 = vadd.f32 %v675_v6, %v623_v0  ;;  %v660_v32 = vmul.f32 %v644_v25, %v625_v12  ;;  %v576_v33 = vadd.f32 %v575_v61, %v493_v16  ;;  %v1867_v34 = vpop.f32.mrb[7].mxu1 }
 0x197   :  { %1455 = vtanh.f32 %v702_v23  ;;  %v705_v35 = vmul.f32 0.7978846, %v689_v26  ;;  %v690_v36 = vadd.f32 %v674_v27, %v572_v4  ;;  %v578_v37 = vadd.f32 %v577_v9, %v494_v18 }
 0x198   :  { %1457 = vtanh.f32 %v704_v24  ;;  %v707_v39 = vmul.f32 0.7978846, %v691_v31  ;;  %v676_v41 = vmul.f32 0.044715, %v660_v32  ;;  %v645_v43 = vmul.f32 %v576_v33, %v576_v33 }
 0x199   :  { %1459 = vtanh.f32 %v705_v35  ;;  %v706_v46 = vmul.f32 0.7978846, %v690_v36  ;;  %v1875_v49 = vmul.f32 0.5, %v576_v33  ;;  %v646_v51 = vmul.f32 %v578_v37, %v578_v37 }
 0x19a   :  { %1461 = vtanh.f32 %v707_v39  ;;  %v692_v0 = vadd.f32 %v676_v41, %v625_v12  ;;  %v661_v1 = vmul.f32 %v645_v43, %v576_v33  ;;  %v1883_v2 = vmul.f32 0.5, %v578_v37 }
 0x19b   :  { %1463 = vtanh.f32 %v706_v46  ;;  %v662_v4 = vmul.f32 %v646_v51, %v578_v37  ;;  %v580_v17 = vadd.f32 %v579_v19, %v497_v44  ;;  %v582_v54 = vadd.f32 %v581_v29, %v498_v45 }
 0x19c   :  { %v708_v55 = vmul.f32 0.7978846, %v692_v0  ;;  %v677_v57 = vmul.f32 0.044715, %v661_v1  ;;  %v629_v58 = vadd.f32 %v628_v10, %v495_v52  ;;  %v631_v59 = vadd.f32 %v630_v20, %v496_v53  ;;  %v500_v52 = vld [vmem:[%s2236_s2 + $0x78] sm:$0xff] }
 0x19d   :  { %v678_v61 = vmul.f32 0.044715, %v662_v4  ;;  %v649_v62 = vmul.f32 %v580_v17, %v580_v17  ;;  %v1885_v63 = vmul.f32 0.5, %v580_v17  ;;  %v650_v3 = vmul.f32 %v582_v54, %v582_v54 }
 0x19e   :  { %1465 = vtanh.f32 %v708_v55  ;;  %v693_v5 = vadd.f32 %v677_v57, %v576_v33  ;;  %v1887_v9 = vmul.f32 0.5, %v582_v54  ;;  %v647_v12 = vmul.f32 %v629_v58, %v629_v58 }
 0x19f   :  { %v1452_v11 = vpop.eup %1451  ;;  %v694_v13 = vadd.f32 %v678_v61, %v578_v37  ;;  %v665_v14 = vmul.f32 %v649_v62, %v580_v17  ;;  %v666_v16 = vmul.f32 %v650_v3, %v582_v54  ;;  %v1889_v18 = vmul.f32 0.5, %v629_v58 }
 0x1a0   :  { %v1454_v19 = vpop.eup %1453  ;;  %v749_v21 = vadd.f32 1.0, %v1452_v11  ;;  %v709_v10 = vmul.f32 0.7978846, %v693_v5  ;;  %v663_v20 = vmul.f32 %v647_v12, %v629_v58  ;;  %v648_v22 = vmul.f32 %v631_v59, %v631_v59  ;;  %v789_v5 = vld [vmem:[%s2237_s3 + $0x40] sm:$0xff] }
 0x1a1   :  { %v1456_v42 = vpop.eup %1455  ;;  %v751_v48 = vadd.f32 1.0, %v1454_v19  ;;  %v710_v23 = vmul.f32 0.7978846, %v694_v13  ;;  %v681_v24 = vmul.f32 0.044715, %v665_v14  ;;  %v1891_v6 = vmul.f32 0.5, %v631_v59 }
 0x1a2   :  { %v1458_v25 = vpop.eup %1457  ;;  %v1894_v26 = vmul.f32 %v749_v21, %v1837_v38  ;;  %v750_v27 = vadd.f32 1.0, %v1456_v42  ;;  %1467 = vtanh.f32 %v709_v10  ;;  %v682_v29 = vmul.f32 0.044715, %v666_v16  ;;  %v499_v38 = vld [vmem:[%s2236_s2 + $0x70] sm:$0xff]  ;;  %v790_v16 = vld [vmem:[%s2237_s3 + $0x48] sm:$0xff] }
 0x1a3   :  { %v1460_v31 = vpop.eup %1459  ;;  %v1897_v32 = vmul.f32 %v751_v48, %v1839_v40  ;;  %v752_v33 = vadd.f32 1.0, %v1458_v25  ;;  %1469 = vtanh.f32 %v710_v23  ;;  %v697_v35 = vadd.f32 %v681_v24, %v580_v17  ;;  %v797_v24 = vld [vmem:[%s2237_s3 + $0x80] sm:$0xff] }
 0x1a4   :  { %v1462_v36 = vpop.eup %1461  ;;  %v1900_v37 = vmul.f32 %v750_v27, %v1847_v47  ;;  %v753_v39 = vadd.f32 1.0, %v1460_v31  ;;  %v698_v41 = vadd.f32 %v682_v29, %v582_v54  ;;  %v679_v43 = vmul.f32 0.044715, %v663_v20  ;;  %v781_v54 = vld [vmem:[%s2237_s3] sm:$0xff] }
 0x1a5   :  { %v1464_v44 = vpop.eup %1463  ;;  %v1906_v45 = vmul.f32 %v752_v33, %v1849_v50  ;;  %v755_v40 = vadd.f32 1.0, %v1462_v36  ;;  %v713_v46 = vmul.f32 0.7978846, %v697_v35  ;;  %v664_v51 = vmul.f32 %v648_v22, %v631_v59  ;;  %v798_v33 = vld [vmem:[%s2237_s3 + $0x88] sm:$0xff]  ;;  %v805_v35 = vld [vmem:[%s2237_s3 + $0xc0] sm:$0xff] }
 0x1a6   :  { %v1912_v47 = vmul.f32 %v753_v39, %v1851_v56  ;;  %v754_v53 = vadd.f32 1.0, %v1464_v44  ;;  %v714_v0 = vmul.f32 0.7978846, %v698_v41  ;;  %v695_v1 = vadd.f32 %v679_v43, %v629_v58 }
 0x1a7   :  { %v1915_v4 = vmul.f32 %v755_v40, %v1853_v60  ;;  %1471 = vtanh.f32 %v713_v46  ;;  %v680_v17 = vmul.f32 0.044715, %v664_v51  ;;  %v633_v50 = vadd.f32 %v1865_v30, %v499_v38  ;;  %v782_v60 = vld [vmem:[%s2237_s3 + $0x8] sm:$0xff] }
 0x1a8   :  { %v1466_v55 = vpop.eup %1465  ;;  %v1922_v57 = vmul.f32 %v754_v53, %v1855_v15  ;;  %1473 = vtanh.f32 %v714_v0  ;;  %v711_v56 = vmul.f32 0.7978846, %v695_v1  ;;  %v635_v61 = vadd.f32 %v1867_v34, %v500_v52  ;;  %v806_v38 = vld [vmem:[%s2237_s3 + $0xc8] sm:$0xff] }
 0x1a9   :  { %v756_v58 = vadd.f32 1.0, %v1466_v55  ;;  %v696_v62 = vadd.f32 %v680_v17, %v631_v59  ;;  %v651_v3 = vmul.f32 %v633_v50, %v633_v50  ;;  %v1928_v30 = vmul.f32 0.5, %v633_v50  ;;  %v791_v17 = vld [vmem:[%s2237_s3 + $0x50] sm:$0xff] }
 0x1aa   :  { %1475 = vtanh.f32 %v711_v56  ;;  %v652_v15 = vmul.f32 %v635_v61, %v635_v61  ;;  %v1933_v12 = vmul.f32 0.5, %v635_v61  ;;  %v1024_v11 = vmul.f32 %v781_v54, %v1897_v32 }
 0x1ab   :  { %v1937_v34 = vmul.f32 %v756_v58, %v1863_v28  ;;  %v712_v13 = vmul.f32 0.7978846, %v696_v62  ;;  %v667_v14 = vmul.f32 %v651_v3, %v633_v50  ;;  %v1025_v59 = vmul.f32 %v782_v60, %v1906_v45  ;;  %v783_v62 = vld [vmem:[%s2237_s3 + $0x10] sm:$0xff] }
 0x1ac   :  { %v1468_v19 = vpop.eup %1467  ;;  %v668_v21 = vmul.f32 %v652_v15, %v635_v61  ;;  %v813_v10 = vmul.f32 %v781_v54, %v1894_v26  ;;  %v814_v20 = vmul.f32 %v782_v60, %v1900_v37  ;;  %v1032_v22 = vmul.f32 %v789_v5, %v1897_v32 }
 0x1ad   :  { %v1470_v42 = vpop.eup %1469  ;;  %v757_v48 = vadd.f32 1.0, %v1468_v19  ;;  %1477 = vtanh.f32 %v712_v13  ;;  %v683_v28 = vmul.f32 0.044715, %v667_v14  ;;  %v1056_v23 = vadd.f32 %v1025_v59, %v1024_v11 }
 0x1ae   :  { %v758_v25 = vadd.f32 1.0, %v1470_v42  ;;  %v684_v27 = vmul.f32 0.044715, %v668_v21  ;;  %v845_v29 = vadd.f32 %v814_v20, %v813_v10  ;;  %v1033_v31 = vmul.f32 %v790_v16, %v1906_v45  ;;  %v807_v20 = vld [vmem:[%s2237_s3 + $0xd0] sm:$0xff] }
 0x1af   :  { %v1957_v36 = vmul.f32 %v757_v48, %v1875_v49  ;;  %v699_v39 = vadd.f32 %v683_v28, %v633_v50  ;;  %1057 = vadd.xlane.f32.xlu1 %v1056_v23  ;;  %v821_v41 = vmul.f32 %v789_v5, %v1894_v26  ;;  %v822_v43 = vmul.f32 %v790_v16, %v1900_v37  ;;  %v799_v28 = vld [vmem:[%s2237_s3 + $0x90] sm:$0xff]  ;;  %v800_v23 = vld [vmem:[%s2237_s3 + $0x98] sm:$0xff] }
 0x1b0   :  { %v1965_v44 = vmul.f32 %v758_v25, %v1883_v2  ;;  %v700_v40 = vadd.f32 %v684_v27, %v635_v61  ;;  %846 = vadd.xlane.f32.xlu0 %v845_v29  ;;  %v1068_v46 = vadd.f32 %v1033_v31, %v1032_v22  ;;  %v829_v51 = vmul.f32 %v797_v24, %v1894_v26  ;;  %v792_v61 = vld [vmem:[%s2237_s3 + $0x58] sm:$0xff]  ;;  %v786_v31 = vld [vmem:[%s2237_s3 + $0x28] sm:$0xff] }
 0x1b1   :  { %v1472_v49 = vpop.eup %1471  ;;  %v715_v52 = vmul.f32 0.7978846, %v699_v39  ;;  %v857_v53 = vadd.f32 %v822_v43, %v821_v41  ;;  %v830_v0 = vmul.f32 %v798_v33, %v1900_v37  ;;  %v837_v1 = vmul.f32 %v805_v35, %v1894_v26 }
 0x1b2   :  { %v1474_v50 = vpop.eup %1473  ;;  %v761_v54 = vadd.f32 1.0, %v1472_v49  ;;  %v716_v2 = vmul.f32 0.7978846, %v700_v40  ;;  %v838_v55 = vmul.f32 %v806_v38, %v1900_v37  ;;  %v1040_v56 = vmul.f32 %v797_v24, %v1897_v32  ;;  %v784_v37 = vld [vmem:[%s2237_s3 + $0x18] sm:$0xff]  ;;  %v785_v24 = vld [vmem:[%s2237_s3 + $0x20] sm:$0xff] }
 0x1b3   :  { %v762_v60 = vadd.f32 1.0, %v1474_v50  ;;  %1479 = vtanh.f32 %v715_v52  ;;  %1069 = vadd.xlane.f32.xlu1 %v1068_v46  ;;  %v869_v58 = vadd.f32 %v830_v0, %v829_v51  ;;  %v1041_v26 = vmul.f32 %v798_v33, %v1906_v45  ;;  %v801_v51 = vld [vmem:[%s2237_s3 + $0xa0] sm:$0xff] }
 0x1b4   :  { %v1476_v3 = vpop.eup %1475  ;;  %v1986_v5 = vmul.f32 %v761_v54, %v1885_v63  ;;  %1481 = vtanh.f32 %v716_v2  ;;  %858 = vadd.xlane.f32.xlu0 %v857_v53  ;;  %v881_v15 = vadd.f32 %v838_v55, %v837_v1  ;;  %v823_v11 = vmul.f32 %v791_v17, %v1912_v47  ;;  %v793_v50 = vld [vmem:[%s2237_s3 + $0x60] sm:$0xff]  ;;  %v794_v54 = vld [vmem:[%s2237_s3 + $0x68] sm:$0xff] }
 0x1b5   :  { %v1990_v13 = vmul.f32 %v762_v60, %v1887_v9  ;;  %v759_v14 = vadd.f32 1.0, %v1476_v3  ;;  %v1080_v59 = vadd.f32 %v1041_v26, %v1040_v56  ;;  %v824_v16 = vmul.f32 %v792_v61, %v1922_v57  ;;  %v808_v9 = vld [vmem:[%s2237_s3 + $0xd8] sm:$0xff] }
 0x1b6   :  { %v1048_v19 = vmul.f32 %v805_v35, %v1897_v32  ;;  %v1049_v21 = vmul.f32 %v806_v38, %v1906_v45  ;;  %v1026_v10 = vmul.f32 %v783_v62, %v1915_v4  ;;  %v1027_v63 = vmul.f32 %v784_v37, %v1937_v34  ;;  %v788_v26 = vld [vmem:[%s2237_s3 + $0x38] sm:$0xff] }
 0x1b7   :  { %v1478_v22 = vpop.eup %1477  ;;  %v2004_v42 = vmul.f32 %v759_v14, %v1889_v18  ;;  %870 = vadd.xlane.f32.xlu1 %v869_v58  ;;  %v860_v32 = vadd.f32 %v824_v16, %v823_v11  ;;  %v815_v45 = vmul.f32 %v783_v62, %v1912_v47  ;;  %v816_v48 = vmul.f32 %v784_v37, %v1922_v57  ;;  %v787_v58 = vld [vmem:[%s2237_s3 + $0x30] sm:$0xff] }
 0x1b8   :  { %v760_v18 = vadd.f32 1.0, %v1478_v22  ;;  %882 = vadd.xlane.f32.xlu0 %v881_v15  ;;  %v1092_v25 = vadd.f32 %v1049_v21, %v1048_v19  ;;  %v1059_v27 = vadd.f32 %v1027_v63, %v1026_v10  ;;  %v1034_v29 = vmul.f32 %v791_v17, %v1915_v4  ;;  %v803_v63 = vld [vmem:[%s2237_s3 + $0xb0] sm:$0xff] }
 0x1b9   :  { %v848_v33 = vadd.f32 %v816_v48, %v815_v45  ;;  %v1035_v35 = vmul.f32 %v792_v61, %v1937_v34  ;;  %v839_v39 = vmul.f32 %v807_v20, %v1912_v47  ;;  %v840_v41 = vmul.f32 %v808_v9, %v1922_v57  ;;  %v795_v45 = vld [vmem:[%s2237_s3 + $0x70] sm:$0xff]  ;;  %v809_v48 = vld [vmem:[%s2237_s3 + $0xe0] sm:$0xff] }
 0x1ba   :  { %v2025_v43 = vmul.f32 %v760_v18, %v1891_v6  ;;  %v831_v38 = vmul.f32 %v799_v28, %v1912_v47  ;;  %v832_v40 = vmul.f32 %v800_v23, %v1922_v57  ;;  %v817_v46 = vmul.f32 %v785_v24, %v1957_v36  ;;  %v802_v6 = vld [vmem:[%s2237_s3 + $0xa8] sm:$0xff] }
 0x1bb   :  { %1081 = vadd.xlane.f32.xlu1 %v1080_v59  ;;  %v1071_v49 = vadd.f32 %v1035_v35, %v1034_v29  ;;  %v2033_v52 = vadd.f32 %v840_v41, %v839_v39  ;;  %v818_v53 = vmul.f32 %v786_v31, %v1965_v44  ;;  %v1042_v0 = vmul.f32 %v799_v28, %v1915_v4  ;;  %v810_v28 = vld [vmem:[%s2237_s3 + $0xe8] sm:$0xff]  ;;  %v811_v39 = vld [vmem:[%s2237_s3 + $0xf0] sm:$0xff]  ;;  %v812_v41 = vld [vmem:[%s2237_s3 + $0xf8] sm:$0xff] }
 0x1bc   :  { %861 = vadd.xlane.f32.xlu0 %v860_v32  ;;  %v2040_v47 = vadd.f32 %v832_v40, %v831_v38  ;;  %v1043_v57 = vmul.f32 %v800_v23, %v1937_v34  ;;  %v1028_v1 = vmul.f32 %v785_v24, %v2004_v42  ;;  %v1029_v17 = vmul.f32 %v786_v31, %v2025_v43 }
 0x1bd   :  { %v1480_v2 = vpop.eup %1479  ;;  %v2051_v55 = vadd.f32 %v818_v53, %v817_v46  ;;  %v1050_v56 = vmul.f32 %v807_v20, %v1915_v4  ;;  %v1051_v61 = vmul.f32 %v808_v9, %v1937_v34  ;;  %v833_v60 = vmul.f32 %v801_v51, %v1957_v36  ;;  %v804_v20 = vld [vmem:[%s2237_s3 + $0xb8] sm:$0xff] }
 0x1be   :  { %v1482_v62 = vpop.eup %1481  ;;  %v763_v37 = vadd.f32 1.0, %v1480_v2  ;;  %v1083_v3 = vadd.f32 %v1043_v57, %v1042_v0  ;;  %v1062_v15 = vadd.f32 %v1029_v17, %v1028_v1  ;;  %v834_v11 = vmul.f32 %v802_v6, %v1965_v44 }
 0x1bf   :  { %v764_v14 = vadd.f32 1.0, %v1482_v62  ;;  %1093 = vadd.xlane.f32.xlu1 %v1092_v25  ;;  %v1095_v4 = vadd.f32 %v1051_v61, %v1050_v56  ;;  %v825_v34 = vmul.f32 %v793_v50, %v1957_v36  ;;  %v826_v59 = vmul.f32 %v794_v54, %v1965_v44 }
 0x1c0   :  { %v779_v16 = vmul.f32 %v763_v37, %v1928_v30  ;;  %1060 = vadd.xlane.f32.xlu0 %v1059_v27  ;;  %v875_v19 = vadd.f32 %v834_v11, %v833_v60  ;;  %v819_v21 = vmul.f32 %v787_v58, %v1986_v5  ;;  %v820_v10 = vmul.f32 %v788_v26, %v1990_v13 }
 0x1c1   :  { %v780_v9 = vmul.f32 %v764_v14, %v1933_v12  ;;  %v863_v22 = vadd.f32 %v826_v59, %v825_v34  ;;  %v1036_v32 = vmul.f32 %v793_v50, %v2004_v42  ;;  %v1037_v30 = vmul.f32 %v794_v54, %v2025_v43  ;;  %v796_v12 = vld [vmem:[%s2237_s3 + $0x78] sm:$0xff] }
 0x1c2   :  { %v854_v23 = vadd.f32 %v820_v10, %v819_v21  ;;  %v1038_v24 = vmul.f32 %v795_v45, %v779_v16  ;;  %v1044_v18 = vmul.f32 %v801_v51, %v2004_v42  ;;  %v1045_v25 = vmul.f32 %v802_v6, %v2025_v43 }
 0x1c3   :  { %849 = vadd.xlane.f32.xlu1 %v848_v33  ;;  %v1074_v27 = vadd.f32 %v1037_v30, %v1036_v32  ;;  %v1039_v29 = vmul.f32 %v796_v12, %v780_v9  ;;  %v835_v31 = vmul.f32 %v803_v63, %v1986_v5  ;;  %v836_v35 = vmul.f32 %v804_v20, %v1990_v13 }
 0x1c4   :  { %1072 = vadd.xlane.f32.xlu0 %v1071_v49  ;;  %v1086_v38 = vadd.f32 %v1045_v25, %v1044_v18  ;;  %v841_v40 = vmul.f32 %v809_v48, %v1957_v36  ;;  %v842_v33 = vmul.f32 %v810_v28, %v1965_v44  ;;  %v1046_v46 = vmul.f32 %v803_v63, %v779_v16 }
 0x1c5   :  { %v1077_v51 = vadd.f32 %v1039_v29, %v1038_v24  ;;  %v878_v53 = vadd.f32 %v836_v35, %v835_v31  ;;  %v1047_v0 = vmul.f32 %v804_v20, %v780_v9  ;;  %v1052_v6 = vmul.f32 %v809_v48, %v2004_v42 }
 0x1c6   :  { %v887_v57 = vadd.f32 %v842_v33, %v841_v40  ;;  %v1053_v1 = vmul.f32 %v810_v28, %v2025_v43  ;;  %v843_v17 = vmul.f32 %v811_v39, %v1986_v5  ;;  %v844_v50 = vmul.f32 %v812_v41, %v1990_v13 }
 0x1c7   :  { %885 = vadd.xlane.f32.xlu1 %v2033_v52  ;;  %v1089_v49 = vadd.f32 %v1047_v0, %v1046_v46  ;;  %v827_v36 = vmul.f32 %v795_v45, %v1986_v5  ;;  %v828_v44 = vmul.f32 %v796_v12, %v1990_v13  ;;  %v1030_v54 = vmul.f32 %v787_v58, %v779_v16 }
 0x1c8   :  { %873 = vadd.xlane.f32.xlu0 %v2040_v47  ;;  %v1098_v2 = vadd.f32 %v1053_v1, %v1052_v6  ;;  %v890_v56 = vadd.f32 %v844_v50, %v843_v17  ;;  %v1031_v42 = vmul.f32 %v788_v26, %v780_v9  ;;  %v1054_v61 = vmul.f32 %v811_v39, %v779_v16 }
 0x1c9   :  { %v866_v60 = vadd.f32 %v828_v44, %v827_v36  ;;  %v1055_v43 = vmul.f32 %v812_v41, %v780_v9  ;;  %v913_v32 = vadd.s32 4294967288, %v1583_v8  ;;  %v910_v30 = vshrl.u32 %v26_v7, 7 }
 0x1ca   :  { %v1065_v62 = vadd.f32 %v1031_v42, %v1030_v54  ;;  %v920_v28 = vadd.s32 4294967280, %v1583_v8 }
 0x1cb   :  { %852 = vadd.xlane.f32.xlu1 %v2051_v55  ;;  %v1101_v37 = vadd.f32 %v1055_v43, %v1054_v61  ;;  %v2132_v12 = vsub.s32 %v913_v32, %v910_v30  ;;  %v2135_v24 = vsub.s32 %v1583_v8, %v910_v30 }
 0x1cc   :  { %1084 = vadd.xlane.f32.xlu0 %v1083_v3 }
 0x1cf   :  { %1063 = vadd.xlane.f32.xlu1 %v1062_v15 }
 0x1d0   :  { %1096 = vadd.xlane.f32.xlu0 %v1095_v4 }
 0x1d3   :  { %876 = vadd.xlane.f32.xlu1 %v875_v19 }
 0x1d4   :  { %864 = vadd.xlane.f32.xlu0 %v863_v22 }
 0x1d7   :  { %855 = vadd.xlane.f32.xlu1 %v854_v23  ;;  %v927_v23 = vadd.s32 4294967272, %v1583_v8 }
 0x1d8   :  { %1075 = vadd.xlane.f32.xlu0 %v1074_v27  ;;  %v2137_v27 = vsub.s32 %v920_v28, %v910_v30 }
 0x1d9   :  { %v2139_v7 = vsub.s32 %v927_v23, %v910_v30 }
 0x1db   :  { %1078 = vadd.xlane.f32.xlu1 %v1077_v51 }
 0x1dc   :  { %1087 = vadd.xlane.f32.xlu0 %v1086_v38 }
 0x1df   :  { %879 = vadd.xlane.f32.xlu1 %v878_v53 }
 0x1e0   :  { %888 = vadd.xlane.f32.xlu0 %v887_v57 }
 0x1e3   :  { %1090 = vadd.xlane.f32.xlu1 %v1089_v49 }
 0x1e4   :  { %1099 = vadd.xlane.f32.xlu0 %v1098_v2 }
 0x1e7   :  { %891 = vadd.xlane.f32.xlu1 %v890_v56 }
 0x1e8   :  { %867 = vadd.xlane.f32.xlu0 %v866_v60 }
 0x1ec   :  { %1066 = vadd.xlane.f32.xlu0 %v1065_v62 }
 0x1f0   :  { %1102 = vadd.xlane.f32.xlu0 %v1101_v37 }
 0x23c   :  { %v1058_v5 = vpop.xlane.xlu1 %1057 }
 0x23d   :  { %v847_v13 = vpop.xlane.xlu0 %846  ;;  %v1123_v35 = vrot.slane %v1058_v5, %v2135_v24 }
 0x23e   :  { %v912_v38 = vrot.slane %v847_v13, %v2135_v24 }
 0x240   :  { %v1070_v52 = vpop.xlane.xlu1 %1069 }
 0x241   :  { %v859_v47 = vpop.xlane.xlu0 %858  ;;  %v1142_v40 = vrot.slane %v1070_v52, %v2135_v24 }
 0x242   :  { %v937_v33 = vrot.slane %v859_v47, %v2135_v24 }
 0x244   :  { %v2110_v55 = vpop.xlane.xlu1 %870 }
 0x245   :  { %v883_v58 = vpop.xlane.xlu0 %882  ;;  %v956_v53 = vrot.slane %v2110_v55, %v2135_v24 }
 0x246   :  { %v975_v0 = vrot.slane %v883_v58, %v2135_v24 }
 0x248   :  { %v2112_v26 = vpop.xlane.xlu1 %1081 }
 0x249   :  { %v862_v3 = vpop.xlane.xlu0 %861  ;;  %v1161_v6 = vrot.slane %v2112_v26, %v2135_v24 }
 0x24a   :  { %v941_v29 = vrot.slane %v862_v3, %v2132_v12 }
 0x24c   :  { %v2114_v15 = vpop.xlane.xlu1 %1093  ;;  %v942_v1 = vsel %vm918_vm11, %v941_v29, %v937_v33  ;;  %v1246_v33 = vld [vmem:[%s2238_s4] ss:$0 sm:$0xff]  ;;  %s1483_s4 = scalar_lea.vmem %s1231_s0, 32 }
 0x24d   :  { %v1061_v11 = vpop.xlane.xlu0 %1060  ;;  %v1180_v28 = vrot.slane %v2114_v15, %v2135_v24  ;;  %p1484_p0 = scmp.ne.s32.totalorder %s1231_s0, %s1483_s4  ;;  %p1489_p2 = scmp.lt.s32.totalorder %s1483_s4, %s1483_s4 }
 0x24e   :  { %v1127_v31 = vrot.slane %v1061_v11, %v2132_v12 }
 0x24f   :  { %p1490_p3 = por %p1489_p2, %p1488_p1 }
 0x250   :  { %v850_v14 = vpop.xlane.xlu1 %849  ;;  %v1128_v17 = vsel %vm918_vm11, %v1127_v31, %v1123_v35 }
 0x251   :  { %v1073_v4 = vpop.xlane.xlu0 %1072  ;;  %v917_v8 = vrot.slane %v850_v14, %v2132_v12  ;;  %p1491_p4 = pnand %p1490_p3, %p1484_p0 }
 0x252   :  { %v1146_v39 = vrot.slane %v1073_v4, %v2132_v12 }
 0x253   :  { %v919_v36 = vsel %vm918_vm11, %v917_v8, %v912_v38 }
 0x254   :  { %v886_v34 = vpop.xlane.xlu1 %885  ;;  %v1147_v44 = vsel %vm918_vm11, %v1146_v39, %v1142_v40 }
 0x255   :  { %v874_v59 = vpop.xlane.xlu0 %873  ;;  %v979_v46 = vrot.slane %v886_v34, %v2132_v12 }
 0x256   :  { %v960_v57 = vrot.slane %v874_v59, %v2132_v12 }
 0x257   :  { %v980_v42 = vsel %vm918_vm11, %v979_v46, %v975_v0 }
 0x258   :  { %v853_v16 = vpop.xlane.xlu1 %852  ;;  %v961_v37 = vsel %vm918_vm11, %v960_v57, %v956_v53 }
 0x259   :  { %v2116_v19 = vpop.xlane.xlu0 %1084  ;;  %v924_v50 = vrot.slane %v853_v16, %v2137_v27 }
 0x25a   :  { %v1165_v5 = vrot.slane %v2116_v19, %v2132_v12 }
 0x25b   :  { %v926_v47 = vsel %vm925_vm12, %v924_v50, %v919_v36 }
 0x25c   :  { %v2118_v21 = vpop.xlane.xlu1 %1063 }
 0x25d   :  { %v2120_v10 = vpop.xlane.xlu0 %1096  ;;  %v1132_v61 = vrot.slane %v2118_v21, %v2137_v27 }
 0x25e   :  { %v1184_v55 = vrot.slane %v2120_v10, %v2132_v12 }
 0x25f   :  { %v1133_v34 = vsel %vm925_vm12, %v1132_v61, %v1128_v17 }
 0x260   :  { %v877_v63 = vpop.xlane.xlu1 %876  ;;  %v1185_v31 = vsel %vm918_vm11, %v1184_v55, %v1180_v28 }
 0x261   :  { %v865_v20 = vpop.xlane.xlu0 %864  ;;  %v965_v54 = vrot.slane %v877_v63, %v2137_v27 }
 0x262   :  { %v946_v49 = vrot.slane %v865_v20, %v2137_v27 }
 0x263   :  { %v966_v3 = vsel %vm925_vm12, %v965_v54, %v961_v37 }
 0x264   :  { %v856_v9 = vpop.xlane.xlu1 %855  ;;  %v947_v58 = vsel %vm925_vm12, %v946_v49, %v942_v1 }
 0x265   :  { %v2122_v22 = vpop.xlane.xlu0 %1075  ;;  %v931_v2 = vrot.slane %v856_v9, %v2139_v7 }
 0x266   :  { %v1151_v26 = vrot.slane %v2122_v22, %v2137_v27 }
 0x267   :  { %v933_v11 = vsel %vm932_vm13, %v931_v2, %v926_v47 }
 0x268   :  { %v2126_v45 = vpop.xlane.xlu1 %1078  ;;  %v1152_v22 = vsel %vm925_vm12, %v1151_v26, %v1147_v44 }
 0x269   :  { %v2128_v48 = vpop.xlane.xlu0 %1087  ;;  %v1156_v14 = vrot.slane %v2126_v45, %v2139_v7 }
 0x26a   :  { %v1170_v10 = vrot.slane %v2128_v48, %v2137_v27 }
 0x26b   :  { %v1157_v48 = vsel %vm932_vm13, %v1156_v14, %v1152_v22 }
 0x26c   :  { %v880_v18 = vpop.xlane.xlu1 %879 }
 0x26d   :  { %v889_v25 = vpop.xlane.xlu0 %888  ;;  %v970_v60 = vrot.slane %v880_v18, %v2139_v7  ;;  %v1166_v18 = vsel %vm918_vm11, %v1165_v5, %v1161_v6 }
 0x26e   :  { %v984_v43 = vrot.slane %v889_v25, %v2137_v27 }
 0x26f   :  { %v971_v59 = vsel %vm932_vm13, %v970_v60, %v966_v3 }
 0x270   :  { %v2146_v41 = vpop.xlane.xlu1 %1090  ;;  %v985_v16 = vsel %vm925_vm12, %v984_v43, %v980_v42 }
 0x271   :  { %v1100_v51 = vpop.xlane.xlu0 %1099  ;;  %v1175_v32 = vrot.slane %v2146_v41, %v2139_v7 }
 0x272   :  { %v1189_v30 = vrot.slane %v1100_v51, %v2137_v27  ;;  %v1171_v27 = vsel %vm925_vm12, %v1170_v10, %v1166_v18 }
 0x273   :  { %v1176_v15 = vsel %vm932_vm13, %v1175_v32, %v1171_v27 }
 0x274   :  { %v892_v56 = vpop.xlane.xlu1 %891  ;;  %v1190_v8 = vsel %vm925_vm12, %v1189_v30, %v1185_v31 }
 0x275   :  { %v868_v62 = vpop.xlane.xlu0 %867  ;;  %v989_v13 = vrot.slane %v892_v56, %v2139_v7 }
 0x276   :  { %v951_v52 = vrot.slane %v868_v62, %v2139_v7 }
 0x277   :  { %v990_v20 = vsel %vm932_vm13, %v989_v13, %v985_v16 }
 0x278   :  { %v952_v4 = vsel %vm932_vm13, %v951_v52, %v947_v58 }
 0x279   :  { %v1067_v19 = vpop.xlane.xlu0 %1066  ;;  %v992_v21 = vsel %vm991_vm14, %v952_v4, %v933_v11 }
 0x27a   :  { %v1137_v63 = vrot.slane %v1067_v19, %v2139_v7  ;;  %v994_v9 = vsel %vm993_vm15, %v971_v59, %v992_v21 }
 0x27b   :  { %v996_v45 = vsel %vm995_vm0, %v990_v20, %v994_v9 }
 0x27c   :  { %v1138_v23 = vsel %vm932_vm13, %v1137_v63, %v1133_v34  ;;  %v999_v12 = vsel %vm998_vm1, %v996_v45, 0.0 }
 0x27d   :  { %1000 = vadd.xlane.f32.xlu1 %v999_v12  ;;  %v1103_v25 = vpop.xlane.xlu0 %1102  ;;  %v1196_v29 = vsel %vm991_vm14, %v1157_v48, %v1138_v23 }
 0x27e   :  { %v1194_v35 = vrot.slane %v1103_v25, %v2139_v7  ;;  %v1197_v41 = vsel %vm993_vm15, %v1176_v15, %v1196_v29 }
 0x280   :  { %v1195_v39 = vsel %vm932_vm13, %v1194_v35, %v1190_v8 }
 0x281   :  { %v1198_v38 = vsel %vm995_vm0, %v1195_v39, %v1197_v41 }
 0x282   :  { %v1200_v40 = vsel %vm998_vm1, %v1198_v38, 0.0 }
 0x283   :  { %1201 = vadd.xlane.f32.xlu0 %v1200_v40 }
 0x28e   :  { %1009 = vbcast.lane.b32.xlu1 %v1246_v33, 256 }
 0x299   :  { %1210 = vbcast.lane.b32.xlu0 %v1246_v33, 256 }
 0x30a   :  { %v1001_v7 = vpop.xlane.xlu1 %1000 }
 0x30e   :  { %v1010_v46 = vpop.permute.xlu1 %1009 }
 0x30f   :  { %v1012_v51 = vadd.f32 %v1010_v46, %v1001_v7 }
 0x310   :  { %v1202_v53 = vpop.xlane.xlu0 %1201 }
 0x311   :  { %1015 = vperm.xlu1 %1447, %v1012_v51  }
 0x314   :  { %v1211_v0 = vpop.permute.xlu0 %1210 }
 0x315   :  { %v1213_v6 = vadd.f32 %v1211_v0, %v1202_v53 }
 0x317   :  { %1216 = vperm.xlu1 %1447, %v1213_v6  }
 0x390   :  { %v1016_v57 = vpop.permute.xlu1 %1015 }
 0x391   :  { %v1020_v1 = vrot.slane %v1016_v57, %v2135_v24 }
 0x393   :  { %1023 = vst.msk [vmem:[#allocation3] sm:$0x1] %vm1022_vm2, %v1020_v1 }
 0x396   :  { %v1217_v17 = vpop.permute.xlu1 %1216 }
 0x397   :  { %v1221_v50 = vrot.slane %v1217_v17, %v2135_v24 }
 0x399   :  { %1223 = vst.msk [vmem:[#allocation3 + $0x1] sm:$0x1] %vm1022_vm2, %v1221_v50 }
 0x39a   :  { %1494 = shalt.err (!%p1491_p4)
}
 0x39b   :  { %s1495_s8 = scalar_lea.hbm %s2239_s5, 32 }
 0x39c   :  { %p1496_p5 = scmp.ne.s32.totalorder %s2239_s5, %s1495_s8  ;;  %p1499_p6 = scmp.lt.u32.totalorder %s1495_s8, %s2239_s5 }
 0x39e   :  { %p1501_p7 = pnand %p1499_p6, %p1496_p5 }
 0x3a0   :  { %1504 = shalt.err (!%p1501_p7)
}
 0x3a1   :  { %1233 = dma.vmem_to_hbm [thread:$0]  %s1231_s0, 32, %s2239_s5, [#allocation4]  }
 0x3a2   :  { %1505 = dma.done.wait [#allocation4], 32  }
 0x3a3   :  { %1506 = vsyncadd [#allocation4], 4294967264 }
 0x3a4   :  { %1237 = vsyncpa [#allocation4], 1 }

</bundles_post_ra>
